<compile_context>
chip_gen: v7x
topology: tpu7x:2x2x1
jax: 0.10.0
libtpu: 0.0.40
codegen_flags: <defaults>
</compile_context>

<pallas_src>
import functools

import jax
import jax.numpy as jnp
from jax.experimental import pallas as pl
from jax.experimental.pallas import tpu as pltpu


def _round_up(x: int, m: int) -> int:
    return ((x + m - 1) // m) * m


def _default_tile_b(batch: int) -> int:
    """Large lane-friendly batch tile: multiple of 128, <= 512 rows, and at least
    two grid steps when the batch allows it (v7x has 2 TensorCores per chip)."""
    bp = _round_up(batch, 128)
    if bp <= 128:
        return bp
    return int(min(512, _round_up(bp // 2, 128)))


def _mlp_kernel(n_hidden, *refs):
    """Fused MLP forward on one batch tile.

    refs = (x_ref, W0, b0, ..., W_{n-1}, b_{n-1}, wf_row, bf, out_ref)
      x_ref:  [tile_b, d]      compute dtype (f32 or bf16)
      W_i:    [in_pad, H_pad]  compute dtype
      b_i:    [1, H_pad]       float32
      wf_row: [1, H_pad]       float32 (final layer weight as a row)
      bf:     [1, 1]           float32
      out:    [1, 1, tile_b]   float32 (batch on the lane axis -> unmasked stores)
    """
    x_ref = refs[0]
    out_ref = refs[-1]
    params = refs[1:-1]
    compute_dtype = x_ref.dtype

    h = x_ref[...]
    for i in range(n_hidden):
        w = params[2 * i][...]
        b = params[2 * i + 1][...]
        z = jnp.dot(h, w, preferred_element_type=jnp.float32) + b   # MXU, f32 accum
        h = jnp.maximum(z, 0.0).astype(compute_dtype)

    # Final Linear(hidden_pad, 1): VPU multiply + XLU lane reduction (no N=1 MXU
    # matmul), fused into the lane-dense output write.
    wf = params[-2][...]                                 # [1, H_pad] f32
    bf = params[-1][...]                                 # [1, 1]     f32
    y = jnp.sum(h.astype(jnp.float32) * wf, axis=-1)     # [tile_b]
    out_ref[...] = (y[None, None, :] + bf.reshape(1, 1, 1)).astype(out_ref.dtype)


def _prepare_params(weights, biases, hidden_pad, compute_dtype):
    """Pad hidden width to `hidden_pad` (exact: zero weights/biases, ReLU(0)=0),
    turn the final layer weight into a row, cast hidden weights to the compute
    dtype (biases and the final layer stay float32)."""
    flat = []
    n_hidden = len(weights) - 1
    for i in range(n_hidden):
        w = weights[i].astype(jnp.float32)
        b = biases[i].astype(jnp.float32).reshape(1, -1)
        in_dim, out_dim = w.shape
        in_pad = in_dim if i == 0 else hidden_pad
        w_p = jnp.zeros((in_pad, hidden_pad), jnp.float32).at[:in_dim, :out_dim].set(w)
        b_p = jnp.zeros((1, hidden_pad), jnp.float32).at[:, :out_dim].set(b)
        flat.append(w_p.astype(compute_dtype))
        flat.append(b_p)                                  # keep f32
    wf = weights[-1].astype(jnp.float32)                  # [hidden, 1]
    bf = biases[-1].astype(jnp.float32).reshape(1, 1)     # [1, 1]
    wf_row = jnp.zeros((1, hidden_pad), jnp.float32).at[:, :wf.shape[0]].set(wf.T)
    flat.extend([wf_row, bf])
    return flat


def _call_mlp(x_p, flat_params, *, tile_b, num_tiles, n_hidden,
              param_buffer_count, vmem_limit_bytes):
    d = x_p.shape[1]

    def param_spec(shape):
        zeros = lambda i, _n=len(shape): (0,) * _n        # constant index: fetched once
        if param_buffer_count is None:
            return pl.BlockSpec(shape, zeros)
        return pl.BlockSpec(shape, zeros, pipeline_mode=pl.Buffered(param_buffer_count))

    in_specs = [pl.BlockSpec((tile_b, d), lambda i: (i, 0))]
    in_specs += [param_spec(p.shape) for p in flat_params]

    return pl.pallas_call(
        functools.partial(_mlp_kernel, n_hidden),
        out_shape=jax.ShapeDtypeStruct((num_tiles, 1, tile_b), jnp.float32),
        grid=(num_tiles,),
        in_specs=in_specs,
        out_specs=pl.BlockSpec((1, 1, tile_b), lambda i: (i, 0, 0)),
        compiler_params=pltpu.CompilerParams(
            dimension_semantics=("parallel",),
            vmem_limit_bytes=vmem_limit_bytes),
    )(x_p, *flat_params)


def deep_nn_forward(x, weights, biases, *, compute_dtype=jnp.float32, tile_b=None):
    """Pallas forward pass equivalent to DeepNN.forward.

    x:       [B, d] float32
    weights: list of [in_dim, out_dim] float32 (transposed vs PyTorch's [out, in])
    biases:  list of [out_dim] float32
    Returns [B] float32 for B > 1, scalar for B == 1 (matching torch .squeeze()).
    """
    B, d = x.shape
    n_hidden = len(weights) - 1
    assert n_hidden >= 1, "DeepNN has at least one hidden layer"
    hidden = weights[0].shape[1]
    hidden_pad = _round_up(hidden, 128)          # fill MXU lanes even for tiny hidden

    if tile_b is None:
        tile_b = _default_tile_b(B)
    Bp = _round_up(B, tile_b)
    num_tiles = Bp // tile_b

    x_p = x.astype(compute_dtype)
    if Bp != B:
        x_p = jnp.pad(x_p, ((0, Bp - B), (0, 0)))  # zero rows: exact, sliced off below

    flat_params = _prepare_params(weights, biases, hidden_pad, compute_dtype)

    # VMEM budget hint: double-buffered x/out tiles + resident params, clamped to
    # [32 MiB, 96 MiB] (raises v5e's 16 MiB / v6e's 32 MiB scoped default; keeps a
    # sane ceiling relative to v7x's 64 MiB physical VMEM).
    itemsize = jnp.dtype(compute_dtype).itemsize
    param_bytes = sum(int(p.size) * p.dtype.itemsize for p in flat_params)
    est = 2 * (tile_b * d * itemsize + tile_b * 4) + 2 * param_bytes
    vmem_limit = int(min(96 * 1024 * 1024, max(32 * 1024 * 1024, 2 * est)))

    call = functools.partial(
        _call_mlp, x_p, flat_params, tile_b=tile_b, num_tiles=num_tiles,
        n_hidden=n_hidden, vmem_limit_bytes=vmem_limit)
    try:
        # Constant-index weights/biases only need a single VMEM buffer.
        out = call(param_buffer_count=1)
    except Exception:
        # pipeline_mode / pl.Buffered unsupported in this build -> default buffering.
        out = call(param_buffer_count=None)

    y = out.reshape(Bp)[:B]
    return jnp.squeeze(y)    # torch .squeeze(): (B,) for B > 1, scalar for B == 1


def init_deep_nn_params(key, d, hidden_size, depth):
    """Matches DeepNN 'standard' init: weight ~ N(0, 1), bias = 0.
    Weights stored as [in_dim, out_dim] (transposed vs torch's [out, in])."""
    weights, biases = [], []
    prev = d
    for out_dim in [hidden_size] * depth + [1]:
        key, sub = jax.random.split(key)
        weights.append(jax.random.normal(sub, (prev, out_dim), dtype=jnp.float32))
        biases.append(jnp.zeros((out_dim,), dtype=jnp.float32))
        prev = out_dim
    return weights, biases


def deep_nn_reference(x, weights, biases, compute_dtype=jnp.float32):
    """Plain-JAX reference with the same dtype policy as the kernel
    (params/activations in compute_dtype, f32 accumulation/biases, final layer
    as an explicit f32 contraction — same math as Linear(hidden, 1))."""
    h = x.astype(compute_dtype)
    for w, b in zip(weights[:-1], biases[:-1]):
        z = jnp.dot(h, w.astype(compute_dtype), preferred_element_type=jnp.float32)
        h = jnp.maximum(z + b.astype(jnp.float32), 0.0).astype(compute_dtype)
    wf = weights[-1].astype(jnp.float32)[:, 0]                    # [hidden]
    y = jnp.sum(h.astype(jnp.float32) * wf[None, :], axis=-1)
    y = y + biases[-1].astype(jnp.float32)[0]
    return jnp.squeeze(y)


if __name__ == "__main__":
    # Small shapes consistent with the module: d=16, hidden=32, depth=3, batch=16.
    d, hidden_size, depth, batch = 16, 32, 3, 16

    key = jax.random.PRNGKey(0)
    key, xkey = jax.random.split(key)
    x = jax.random.normal(xkey, (batch, d), dtype=jnp.float32)
    weights, biases = init_deep_nn_params(key, d, hidden_size, depth)

    # float32 end-to-end: exact-semantics check.
    y_ref32 = deep_nn_reference(x, weights, biases, compute_dtype=jnp.float32)
    y32 = jax.block_until_ready(
        deep_nn_forward(x, weights, biases, compute_dtype=jnp.float32))
    assert y32.shape == (batch,), y32.shape
    assert jnp.allclose(y32, y_ref32, rtol=1e-4, atol=1e-3), "fp32 kernel mismatch"

    # bfloat16 weights/activations with f32 accumulation (MXU-native fast path).
    y_refbf = deep_nn_reference(x, weights, biases, compute_dtype=jnp.bfloat16)
    ybf = jax.block_until_ready(
        deep_nn_forward(x, weights, biases, compute_dtype=jnp.bfloat16))
    assert ybf.shape == (batch,), ybf.shape
    assert jnp.allclose(ybf, y_refbf, rtol=1e-2, atol=1e-2), "bf16 kernel mismatch"

    print("KERNEL_OK")
</pallas_src>

<mosaic_0001>
module attributes {stable_mosaic.version = 11 : i64} {
  func.func @_mlp_kernel(%arg0: i32, %arg1: memref<128x16xf32, #tpu.memory_space<vmem>>, %arg2: memref<16x128xf32, #tpu.memory_space<vmem>>, %arg3: memref<1x128xf32, #tpu.memory_space<vmem>>, %arg4: memref<128x128xf32, #tpu.memory_space<vmem>>, %arg5: memref<1x128xf32, #tpu.memory_space<vmem>>, %arg6: memref<128x128xf32, #tpu.memory_space<vmem>>, %arg7: memref<1x128xf32, #tpu.memory_space<vmem>>, %arg8: memref<1x128xf32, #tpu.memory_space<vmem>>, %arg9: memref<1x1xf32, #tpu.memory_space<vmem>>, %arg10: memref<1x1x128xf32, #tpu.memory_space<vmem>>) attributes {dimension_semantics = [#tpu.dimension_semantics<parallel>], iteration_bounds = array<i64: 1>, scalar_prefetch = 0 : i64, scratch_operands = 0 : i64, tpu.core_type = #tpu.core_type<tc>, window_params = [{transform_indices = @transform_0, window_bounds = array<i64: 128, 16>}, {pipeline_mode = #tpu.pipeline_mode<synchronous>, transform_indices = @transform_1, window_bounds = array<i64: 16, 128>}, {pipeline_mode = #tpu.pipeline_mode<synchronous>, transform_indices = @transform_2, window_bounds = array<i64: 1, 128>}, {pipeline_mode = #tpu.pipeline_mode<synchronous>, transform_indices = @transform_3, window_bounds = array<i64: 128, 128>}, {pipeline_mode = #tpu.pipeline_mode<synchronous>, transform_indices = @transform_4, window_bounds = array<i64: 1, 128>}, {pipeline_mode = #tpu.pipeline_mode<synchronous>, transform_indices = @transform_5, window_bounds = array<i64: 128, 128>}, {pipeline_mode = #tpu.pipeline_mode<synchronous>, transform_indices = @transform_6, window_bounds = array<i64: 1, 128>}, {pipeline_mode = #tpu.pipeline_mode<synchronous>, transform_indices = @transform_7, window_bounds = array<i64: 1, 128>}, {pipeline_mode = #tpu.pipeline_mode<synchronous>, transform_indices = @transform_8, window_bounds = array<i64: 1, 1>}, {transform_indices = @transform_9, window_bounds = array<i64: 1, 1, 128>}]} {
    %c0 = arith.constant 0 : index
    %c0_0 = arith.constant 0 : index
    %0 = vector.load %arg1[%c0, %c0_0] : memref<128x16xf32, #tpu.memory_space<vmem>>, vector<128x16xf32>
    %c0_1 = arith.constant 0 : index
    %c0_2 = arith.constant 0 : index
    %1 = vector.load %arg2[%c0_1, %c0_2] : memref<16x128xf32, #tpu.memory_space<vmem>>, vector<16x128xf32>
    %c0_3 = arith.constant 0 : index
    %c0_4 = arith.constant 0 : index
    %2 = vector.load %arg3[%c0_3, %c0_4] : memref<1x128xf32, #tpu.memory_space<vmem>>, vector<1x128xf32>
    %cst = arith.constant dense<0.000000e+00> : vector<128x128xf32>
    %3 = tpu.matmul %0, %1, %cst {dimension_numbers = #tpu.dot_dimension_numbers<[1], [0], [0], [1], [0, 0, 1, 1], [], []>} : vector<128x16xf32>, vector<16x128xf32>, vector<128x128xf32> -> vector<128x128xf32>
    %4 = vector.broadcast %2 : vector<1x128xf32> to vector<128x128xf32>
    %5 = arith.addf %3, %4 : vector<128x128xf32>
    %cst_5 = arith.constant 0.000000e+00 : f32
    %6 = vector.broadcast %cst_5 : f32 to vector<128x128xf32>
    %7 = arith.maximumf %5, %6 : vector<128x128xf32>
    %c0_6 = arith.constant 0 : index
    %c0_7 = arith.constant 0 : index
    %8 = vector.load %arg4[%c0_6, %c0_7] : memref<128x128xf32, #tpu.memory_space<vmem>>, vector<128x128xf32>
    %c0_8 = arith.constant 0 : index
    %c0_9 = arith.constant 0 : index
    %9 = vector.load %arg5[%c0_8, %c0_9] : memref<1x128xf32, #tpu.memory_space<vmem>>, vector<1x128xf32>
    %cst_10 = arith.constant dense<0.000000e+00> : vector<128x128xf32>
    %10 = tpu.matmul %7, %8, %cst_10 {dimension_numbers = #tpu.dot_dimension_numbers<[1], [0], [0], [1], [0, 0, 1, 1], [], []>} : vector<128x128xf32>, vector<128x128xf32>, vector<128x128xf32> -> vector<128x128xf32>
    %11 = vector.broadcast %9 : vector<1x128xf32> to vector<128x128xf32>
    %12 = arith.addf %10, %11 : vector<128x128xf32>
    %cst_11 = arith.constant 0.000000e+00 : f32
    %13 = vector.broadcast %cst_11 : f32 to vector<128x128xf32>
    %14 = arith.maximumf %12, %13 : vector<128x128xf32>
    %c0_12 = arith.constant 0 : index
    %c0_13 = arith.constant 0 : index
    %15 = vector.load %arg6[%c0_12, %c0_13] : memref<128x128xf32, #tpu.memory_space<vmem>>, vector<128x128xf32>
    %c0_14 = arith.constant 0 : index
    %c0_15 = arith.constant 0 : index
    %16 = vector.load %arg7[%c0_14, %c0_15] : memref<1x128xf32, #tpu.memory_space<vmem>>, vector<1x128xf32>
    %cst_16 = arith.constant dense<0.000000e+00> : vector<128x128xf32>
    %17 = tpu.matmul %14, %15, %cst_16 {dimension_numbers = #tpu.dot_dimension_numbers<[1], [0], [0], [1], [0, 0, 1, 1], [], []>} : vector<128x128xf32>, vector<128x128xf32>, vector<128x128xf32> -> vector<128x128xf32>
    %18 = vector.broadcast %16 : vector<1x128xf32> to vector<128x128xf32>
    %19 = arith.addf %17, %18 : vector<128x128xf32>
    %cst_17 = arith.constant 0.000000e+00 : f32
    %20 = vector.broadcast %cst_17 : f32 to vector<128x128xf32>
    %21 = arith.maximumf %19, %20 : vector<128x128xf32>
    %c0_18 = arith.constant 0 : index
    %c0_19 = arith.constant 0 : index
    %22 = vector.load %arg8[%c0_18, %c0_19] : memref<1x128xf32, #tpu.memory_space<vmem>>, vector<1x128xf32>
    %c0_20 = arith.constant 0 : index
    %c0_21 = arith.constant 0 : index
    %23 = vector.load %arg9[%c0_20, %c0_21] : memref<1x1xf32, #tpu.memory_space<vmem>>, vector<1x1xf32>
    %24 = vector.broadcast %22 : vector<1x128xf32> to vector<128x128xf32>
    %25 = arith.mulf %21, %24 : vector<128x128xf32>
    %cst_22 = arith.constant dense<0.000000e+00> : vector<128xf32>
    %26 = vector.multi_reduction <add>, %25, %cst_22 [1] : vector<128x128xf32> to vector<128xf32>
    %27 = vector.shape_cast %26 : vector<128xf32> to vector<1x1x128xf32>
    %28 = vector.shape_cast %23 : vector<1x1xf32> to vector<1x1x1xf32>
    %29 = vector.broadcast %28 : vector<1x1x1xf32> to vector<1x1x128xf32>
    %30 = arith.addf %27, %29 : vector<1x1x128xf32>
    %c0_23 = arith.constant 0 : index
    %c0_24 = arith.constant 0 : index
    %c0_25 = arith.constant 0 : index
    %31 = vector.load %arg10[%c0_23, %c0_24, %c0_25] : memref<1x1x128xf32, #tpu.memory_space<vmem>>, vector<1x1x128xf32>
    tpu.vector_store %arg10[%c0_23, %c0_24, %c0_25], %30 {strides = array<i32>} : memref<1x1x128xf32, #tpu.memory_space<vmem>>, vector<1x1x128xf32>,
    return
  }
  func.func @transform_0(%arg0: i32) -> (i32, i32) {
    %c0_i32 = arith.constant 0 : i32
    %c0_i32_0 = arith.constant 0 : i32
    return %arg0, %c0_i32 : i32, i32
  }
  func.func @transform_1(%arg0: i32) -> (i32, i32) {
    %c0_i32 = arith.constant 0 : i32
    %c0_i32_0 = arith.constant 0 : i32
    %c0_i32_1 = arith.constant 0 : i32
    return %c0_i32, %c0_i32_0 : i32, i32
  }
  func.func @transform_2(%arg0: i32) -> (i32, i32) {
    %c0_i32 = arith.constant 0 : i32
    %c0_i32_0 = arith.constant 0 : i32
    %c0_i32_1 = arith.constant 0 : i32
    return %c0_i32, %c0_i32_0 : i32, i32
  }
  func.func @transform_3(%arg0: i32) -> (i32, i32) {
    %c0_i32 = arith.constant 0 : i32
    %c0_i32_0 = arith.constant 0 : i32
    %c0_i32_1 = arith.constant 0 : i32
    return %c0_i32, %c0_i32_0 : i32, i32
  }
  func.func @transform_4(%arg0: i32) -> (i32, i32) {
    %c0_i32 = arith.constant 0 : i32
    %c0_i32_0 = arith.constant 0 : i32
    %c0_i32_1 = arith.constant 0 : i32
    return %c0_i32, %c0_i32_0 : i32, i32
  }
  func.func @transform_5(%arg0: i32) -> (i32, i32) {
    %c0_i32 = arith.constant 0 : i32
    %c0_i32_0 = arith.constant 0 : i32
    %c0_i32_1 = arith.constant 0 : i32
    return %c0_i32, %c0_i32_0 : i32, i32
  }
  func.func @transform_6(%arg0: i32) -> (i32, i32) {
    %c0_i32 = arith.constant 0 : i32
    %c0_i32_0 = arith.constant 0 : i32
    %c0_i32_1 = arith.constant 0 : i32
    return %c0_i32, %c0_i32_0 : i32, i32
  }
  func.func @transform_7(%arg0: i32) -> (i32, i32) {
    %c0_i32 = arith.constant 0 : i32
    %c0_i32_0 = arith.constant 0 : i32
    %c0_i32_1 = arith.constant 0 : i32
    return %c0_i32, %c0_i32_0 : i32, i32
  }
  func.func @transform_8(%arg0: i32) -> (i32, i32) {
    %c0_i32 = arith.constant 0 : i32
    %c0_i32_0 = arith.constant 0 : i32
    %c0_i32_1 = arith.constant 0 : i32
    return %c0_i32, %c0_i32_0 : i32, i32
  }
  func.func @transform_9(%arg0: i32) -> (i32, i32, i32) {
    %c0_i32 = arith.constant 0 : i32
    %c0_i32_0 = arith.constant 0 : i32
    %c0_i32_1 = arith.constant 0 : i32
    return %arg0, %c0_i32, %c0_i32_0 : i32, i32, i32
  }
}

module attributes {stable_mosaic.version = 11 : i64} {
  func.func @_mlp_kernel(%arg0: i32, %arg1: memref<128x16xf32, #tpu.memory_space<vmem>>, %arg2: memref<16x128xf32, #tpu.memory_space<vmem>>, %arg3: memref<1x128xf32, #tpu.memory_space<vmem>>, %arg4: memref<128x128xf32, #tpu.memory_space<vmem>>, %arg5: memref<1x128xf32, #tpu.memory_space<vmem>>, %arg6: memref<128x128xf32, #tpu.memory_space<vmem>>, %arg7: memref<1x128xf32, #tpu.memory_space<vmem>>, %arg8: memref<1x128xf32, #tpu.memory_space<vmem>>, %arg9: memref<1x1xf32, #tpu.memory_space<vmem>>, %arg10: memref<1x1x128xf32, #tpu.memory_space<vmem>>) attributes {dimension_semantics = [#tpu.dimension_semantics<parallel>], iteration_bounds = array<i64: 1>, scalar_prefetch = 0 : i64, scratch_operands = 0 : i64, tpu.core_type = #tpu.core_type<tc>, window_params = [{transform_indices = @transform_0, window_bounds = array<i64: 128, 16>}, {pipeline_mode = #tpu.pipeline_mode<synchronous>, transform_indices = @transform_1, window_bounds = array<i64: 16, 128>}, {pipeline_mode = #tpu.pipeline_mode<synchronous>, transform_indices = @transform_2, window_bounds = array<i64: 1, 128>}, {pipeline_mode = #tpu.pipeline_mode<synchronous>, transform_indices = @transform_3, window_bounds = array<i64: 128, 128>}, {pipeline_mode = #tpu.pipeline_mode<synchronous>, transform_indices = @transform_4, window_bounds = array<i64: 1, 128>}, {pipeline_mode = #tpu.pipeline_mode<synchronous>, transform_indices = @transform_5, window_bounds = array<i64: 128, 128>}, {pipeline_mode = #tpu.pipeline_mode<synchronous>, transform_indices = @transform_6, window_bounds = array<i64: 1, 128>}, {pipeline_mode = #tpu.pipeline_mode<synchronous>, transform_indices = @transform_7, window_bounds = array<i64: 1, 128>}, {pipeline_mode = #tpu.pipeline_mode<synchronous>, transform_indices = @transform_8, window_bounds = array<i64: 1, 1>}, {transform_indices = @transform_9, window_bounds = array<i64: 1, 1, 128>}]} {
    %c0 = arith.constant 0 : index
    %c0_0 = arith.constant 0 : index
    %0 = vector.load %arg1[%c0, %c0_0] : memref<128x16xf32, #tpu.memory_space<vmem>>, vector<128x16xf32>
    %c0_1 = arith.constant 0 : index
    %c0_2 = arith.constant 0 : index
    %1 = vector.load %arg2[%c0_1, %c0_2] : memref<16x128xf32, #tpu.memory_space<vmem>>, vector<16x128xf32>
    %c0_3 = arith.constant 0 : index
    %c0_4 = arith.constant 0 : index
    %2 = vector.load %arg3[%c0_3, %c0_4] : memref<1x128xf32, #tpu.memory_space<vmem>>, vector<1x128xf32>
    %cst = arith.constant dense<0.000000e+00> : vector<128x128xf32>
    %3 = tpu.matmul %0, %1, %cst {dimension_numbers = #tpu.dot_dimension_numbers<[1], [0], [0], [1], [0, 0, 1, 1], [], []>} : vector<128x16xf32>, vector<16x128xf32>, vector<128x128xf32> -> vector<128x128xf32>
    %4 = vector.broadcast %2 : vector<1x128xf32> to vector<128x128xf32>
    %5 = arith.addf %3, %4 : vector<128x128xf32>
    %cst_5 = arith.constant 0.000000e+00 : f32
    %6 = vector.broadcast %cst_5 : f32 to vector<128x128xf32>
    %7 = arith.maximumf %5, %6 : vector<128x128xf32>
    %c0_6 = arith.constant 0 : index
    %c0_7 = arith.constant 0 : index
    %8 = vector.load %arg4[%c0_6, %c0_7] : memref<128x128xf32, #tpu.memory_space<vmem>>, vector<128x128xf32>
    %c0_8 = arith.constant 0 : index
    %c0_9 = arith.constant 0 : index
    %9 = vector.load %arg5[%c0_8, %c0_9] : memref<1x128xf32, #tpu.memory_space<vmem>>, vector<1x128xf32>
    %cst_10 = arith.constant dense<0.000000e+00> : vector<128x128xf32>
    %10 = tpu.matmul %7, %8, %cst_10 {dimension_numbers = #tpu.dot_dimension_numbers<[1], [0], [0], [1], [0, 0, 1, 1], [], []>} : vector<128x128xf32>, vector<128x128xf32>, vector<128x128xf32> -> vector<128x128xf32>
    %11 = vector.broadcast %9 : vector<1x128xf32> to vector<128x128xf32>
    %12 = arith.addf %10, %11 : vector<128x128xf32>
    %cst_11 = arith.constant 0.000000e+00 : f32
    %13 = vector.broadcast %cst_11 : f32 to vector<128x128xf32>
    %14 = arith.maximumf %12, %13 : vector<128x128xf32>
    %c0_12 = arith.constant 0 : index
    %c0_13 = arith.constant 0 : index
    %15 = vector.load %arg6[%c0_12, %c0_13] : memref<128x128xf32, #tpu.memory_space<vmem>>, vector<128x128xf32>
    %c0_14 = arith.constant 0 : index
    %c0_15 = arith.constant 0 : index
    %16 = vector.load %arg7[%c0_14, %c0_15] : memref<1x128xf32, #tpu.memory_space<vmem>>, vector<1x128xf32>
    %cst_16 = arith.constant dense<0.000000e+00> : vector<128x128xf32>
    %17 = tpu.matmul %14, %15, %cst_16 {dimension_numbers = #tpu.dot_dimension_numbers<[1], [0], [0], [1], [0, 0, 1, 1], [], []>} : vector<128x128xf32>, vector<128x128xf32>, vector<128x128xf32> -> vector<128x128xf32>
    %18 = vector.broadcast %16 : vector<1x128xf32> to vector<128x128xf32>
    %19 = arith.addf %17, %18 : vector<128x128xf32>
    %cst_17 = arith.constant 0.000000e+00 : f32
    %20 = vector.broadcast %cst_17 : f32 to vector<128x128xf32>
    %21 = arith.maximumf %19, %20 : vector<128x128xf32>
    %c0_18 = arith.constant 0 : index
    %c0_19 = arith.constant 0 : index
    %22 = vector.load %arg8[%c0_18, %c0_19] : memref<1x128xf32, #tpu.memory_space<vmem>>, vector<1x128xf32>
    %c0_20 = arith.constant 0 : index
    %c0_21 = arith.constant 0 : index
    %23 = vector.load %arg9[%c0_20, %c0_21] : memref<1x1xf32, #tpu.memory_space<vmem>>, vector<1x1xf32>
    %24 = vector.broadcast %22 : vector<1x128xf32> to vector<128x128xf32>
    %25 = arith.mulf %21, %24 : vector<128x128xf32>
    %cst_22 = arith.constant dense<0.000000e+00> : vector<128xf32>
    %26 = vector.multi_reduction <add>, %25, %cst_22 [1] : vector<128x128xf32> to vector<128xf32>
    %27 = vector.shape_cast %26 : vector<128xf32> to vector<1x1x128xf32>
    %28 = vector.shape_cast %23 : vector<1x1xf32> to vector<1x1x1xf32>
    %29 = vector.broadcast %28 : vector<1x1x1xf32> to vector<1x1x128xf32>
    %30 = arith.addf %27, %29 : vector<1x1x128xf32>
    %c0_23 = arith.constant 0 : index
    %c0_24 = arith.constant 0 : index
    %c0_25 = arith.constant 0 : index
    %31 = vector.load %arg10[%c0_23, %c0_24, %c0_25] : memref<1x1x128xf32, #tpu.memory_space<vmem>>, vector<1x1x128xf32>
    tpu.vector_store %arg10[%c0_23, %c0_24, %c0_25], %30 {strides = array<i32>} : memref<1x1x128xf32, #tpu.memory_space<vmem>>, vector<1x1x128xf32>,
    return
  }
  func.func @transform_0(%arg0: i32) -> (i32, i32) {
    %c0_i32 = arith.constant 0 : i32
    %c0_i32_0 = arith.constant 0 : i32
    return %arg0, %c0_i32 : i32, i32
  }
  func.func @transform_1(%arg0: i32) -> (i32, i32) {
    %c0_i32 = arith.constant 0 : i32
    %c0_i32_0 = arith.constant 0 : i32
    %c0_i32_1 = arith.constant 0 : i32
    return %c0_i32, %c0_i32_0 : i32, i32
  }
  func.func @transform_2(%arg0: i32) -> (i32, i32) {
    %c0_i32 = arith.constant 0 : i32
    %c0_i32_0 = arith.constant 0 : i32
    %c0_i32_1 = arith.constant 0 : i32
    return %c0_i32, %c0_i32_0 : i32, i32
  }
  func.func @transform_3(%arg0: i32) -> (i32, i32) {
    %c0_i32 = arith.constant 0 : i32
    %c0_i32_0 = arith.constant 0 : i32
    %c0_i32_1 = arith.constant 0 : i32
    return %c0_i32, %c0_i32_0 : i32, i32
  }
  func.func @transform_4(%arg0: i32) -> (i32, i32) {
    %c0_i32 = arith.constant 0 : i32
    %c0_i32_0 = arith.constant 0 : i32
    %c0_i32_1 = arith.constant 0 : i32
    return %c0_i32, %c0_i32_0 : i32, i32
  }
  func.func @transform_5(%arg0: i32) -> (i32, i32) {
    %c0_i32 = arith.constant 0 : i32
    %c0_i32_0 = arith.constant 0 : i32
    %c0_i32_1 = arith.constant 0 : i32
    return %c0_i32, %c0_i32_0 : i32, i32
  }
  func.func @transform_6(%arg0: i32) -> (i32, i32) {
    %c0_i32 = arith.constant 0 : i32
    %c0_i32_0 = arith.constant 0 : i32
    %c0_i32_1 = arith.constant 0 : i32
    return %c0_i32, %c0_i32_0 : i32, i32
  }
  func.func @transform_7(%arg0: i32) -> (i32, i32) {
    %c0_i32 = arith.constant 0 : i32
    %c0_i32_0 = arith.constant 0 : i32
    %c0_i32_1 = arith.constant 0 : i32
    return %c0_i32, %c0_i32_0 : i32, i32
  }
  func.func @transform_8(%arg0: i32) -> (i32, i32) {
    %c0_i32 = arith.constant 0 : i32
    %c0_i32_0 = arith.constant 0 : i32
    %c0_i32_1 = arith.constant 0 : i32
    return %c0_i32, %c0_i32_0 : i32, i32
  }
  func.func @transform_9(%arg0: i32) -> (i32, i32, i32) {
    %c0_i32 = arith.constant 0 : i32
    %c0_i32_0 = arith.constant 0 : i32
    %c0_i32_1 = arith.constant 0 : i32
    return %arg0, %c0_i32, %c0_i32_0 : i32, i32, i32
  }
}

</mosaic_0001>

<bundles_post_ra>
// kernel: tpu_custom_call.1
= control target key start
LH: loop header
LB: loop body
LE: loop exit
PB: predicated region body
PF: predicated region fallthrough
CT: control target
= control target key end

     0   :  { %s1547_s0 = inlined_call_operand.vmem [shape: f32[128,16], index: 0, kind: input, shape index: {}]   ;;  %s1548_s1 = inlined_call_operand.vmem [shape: f32[16,128], index: 1, kind: input, shape index: {}]   ;;  %s1549_s2 = inlined_call_operand.vmem [shape: f32[1,128], index: 2, kind: input, shape index: {}]   ;;  %s1550_s3 = inlined_call_operand.vmem [shape: f32[128,128], index: 3, kind: input, shape index: {}]   ;;  %s1551_s4 = inlined_call_operand.vmem [shape: f32[1,128], index: 4, kind: input, shape index: {}]   ;;  %s1552_s5 = inlined_call_operand.hbm [shape: f32[128,128], index: 5, kind: input, shape index: {}]   ;;  %s1553_s6 = inlined_call_operand.vmem [shape: f32[1,128], index: 6, kind: input, shape index: {}]   ;;  %s1554_s7 = inlined_call_operand.vmem [shape: f32[1,128], index: 7, kind: input, shape index: {}]   ;;  %s1555_s8 = inlined_call_operand.<no memory space> [shape: f32[1,1], index: 8, kind: input, shape index: {}]   ;;  %s1556_s9 = inlined_call_operand.hbm [shape: f32[1,1,128], index: 9, kind: output, shape index: {}]  }
   0x1   :  { %v14_v0 = vstv %s1555_s8 }
   0x2   :  { %15 = vst [vmem:[#allocation2] sm:$0x1] %v14_v0 }
   0x3   :  { %16 = vsyncpa [#allocation4], 0 }
   0x4   :  { %17 = vsyncpa [#allocation5], 0  ;;  %s1242_s11 = smov [#allocation3]   ;;  %s1194_s15 = scalar_lea.hbm %s1552_s5, 2048 }
   0x5   :  { %s33_s12 = sshll.u32 %s1242_s11, 4  ;;  %p1195_p0 = scmp.ne.s32.totalorder %s1552_s5, %s1194_s15  ;;  %s34_s12 = int_to_ptr.vmem [resolvable:$true] %s33_s12 }
   0x6   :  { %p1198_p1 = scmp.lt.u32.totalorder %s1194_s15, %s1552_s5 }
   0x8   :  { %p1200_p2 = pnand %p1198_p1, %p1195_p0 }
   0xa   :  { %1203 = shalt.err (!%p1200_p2)
}
   0xb   :  { %s1204_s8 = scalar_lea.vmem %s34_s12, 2048  ;;  %p1209_p4 = scmp.lt.s32.totalorder %s34_s12, %s34_s12 }
   0xc   :  { %p1205_p3 = scmp.ne.s32.totalorder %s34_s12, %s1204_s8  ;;  %p1210_p5 = scmp.lt.s32.totalorder %s1204_s8, %s1204_s8 }
   0xe   :  { %p1211_p6 = por %p1210_p5, %p1209_p4 }
  0x10   :  { %p1212_p7 = pnand %p1211_p6, %p1205_p3 }
  0x12   :  { %1215 = shalt.err (!%p1212_p7)
}
  0x13   :  { %s1243_s20 = smov 128   ;;  %s1244_s21 = smov 8  }
  0x14   :  { %39 = dma.hbm_to_vmem [thread:$0]  %s1552_s5, 2048, %s34_s12, [#allocation4], %s1243_s20, %s1243_s20, %s1244_s21  }
  0x15   :  { %1238 = dma.done.wait [#allocation4], 2048  }
  0x16   :  { %1239 = vsyncadd [#allocation4], 4294965248  ;;  %vm74_vm0 = vcmask 130048   ;;  %v65_v1 = vld [vmem:[%s1548_s1] sm:$0xff]  ;;  %v66_v2 = vld [vmem:[%s1548_s1 + $0x8] sm:$0xff]  ;;  %vm760_vm1 = vcmask 130112  }
  0x17   :  { %v49_v3 = vld [vmem:[%s1547_s0] sm:$0xff]  ;;  %v1119_v4 = vpack.c.bf16 %v66_v2, %v65_v1  ;;  %v50_v5 = vld [vmem:[%s1547_s0 + $0x8] sm:$0xff]  ;;  %v51_v6 = vld [vmem:[%s1547_s0 + $0x10] sm:$0xff]  ;;  %vm767_vm2 = vcmask 195712   ;;  %vm774_vm3 = vcmask 261312   ;;  %vm781_vm4 = vcmask 326912  }
  0x18   :  { %983 = vmatprep.mubr.msk.f32.mxu0 %vm74_vm0, %v49_v3  ;;  %v284_v7 = vld [vmem:[%s1550_s3] sm:$0xff]  ;;  %v285_v8 = vld [vmem:[%s1550_s3 + $0x8] sm:$0xff]  ;;  %v286_v9 = vld [vmem:[%s1550_s3 + $0x10] sm:$0xff]  ;;  %vm788_vm5 = vcmask 392512   ;;  %vm795_vm6 = vcmask 458112   ;;  %vm802_vm7 = vcmask 523712  }
  0x19   :  { %1120 = vmatprep.subr.bf16.mxu0 %v1119_v4  ;;  %v1123_v10 = vpack.c.bf16 %v285_v8, %v284_v7  ;;  %v287_v11 = vld [vmem:[%s1550_s3 + $0x18] sm:$0xff]  ;;  %v288_v14 = vld [vmem:[%s1550_s3 + $0x20] sm:$0xff]  ;;  %v289_v15 = vld [vmem:[%s1550_s3 + $0x28] sm:$0xff]  ;;  %vm809_vm8 = vcmask 589312   ;;  %vm816_vm9 = vcmask 654912   ;;  %vm823_vm10 = vcmask 720512  }
  0x1a   :  { %1122 = vmatpush3.bf16.msra.mxu0 %v1119_v4  ;;  %v52_v12 = vld [vmem:[%s1547_s0 + $0x18] sm:$0xff]  ;;  %v1127_v13 = vpack.c.bf16 %v287_v11, %v286_v9  ;;  %v53_v16 = vld [vmem:[%s1547_s0 + $0x20] sm:$0xff]  ;;  %v1131_v17 = vpack.c.bf16 %v289_v15, %v288_v14  ;;  %v54_v18 = vld [vmem:[%s1547_s0 + $0x28] sm:$0xff]  ;;  %vm830_vm11 = vcmask 786112   ;;  %vm837_vm12 = vcmask 851712  }
  0x1b   :  { %1124 = vmatprep.subr.bf16.mxu1 %v1123_v10  ;;  %v290_v19 = vld [vmem:[%s1550_s3 + $0x30] sm:$0xff]  ;;  %v291_v20 = vld [vmem:[%s1550_s3 + $0x38] sm:$0xff]  ;;  %v292_v24 = vld [vmem:[%s1550_s3 + $0x40] sm:$0xff]  ;;  %vm844_vm13 = vcmask 917312   ;;  %vm851_vm14 = vcmask 982912   ;;  %vm858_vm15 = vcmask 1048512  }
  0x1c   :  { %1126 = vmatpush3.bf16.msra.mxu1 %v1123_v10  ;;  %v55_v21 = vld [vmem:[%s1547_s0 + $0x30] sm:$0xff]  ;;  %v1135_v22 = vpack.c.bf16 %v291_v20, %v290_v19  ;;  %v56_v23 = vld [vmem:[%s1547_s0 + $0x38] sm:$0xff]  ;;  %v293_v25 = vld [vmem:[%s1550_s3 + $0x48] sm:$0xff] }
  0x1d   :  { %984 = vmatmul.mubr.msk.f32.vlgmr.msra.gmra.mrb[0].mxu0 %vm74_vm0, %v50_v5  ;;  %1128 = vmatprep.subr.bf16.mxu1 %v1127_v13  ;;  %v57_v26 = vld [vmem:[%s1547_s0 + $0x40] sm:$0xff]  ;;  %v1139_v27 = vpack.c.bf16 %v293_v25, %v292_v24  ;;  %v58_v28 = vld [vmem:[%s1547_s0 + $0x48] sm:$0xff]  ;;  %v294_v29 = vld [vmem:[%s1550_s3 + $0x50] sm:$0xff] }
  0x1e   :  { %986 = vmatprep.mubr.msk.f32.mxu0 %vm74_vm0, %v51_v6  ;;  %v295_v30 = vld [vmem:[%s1550_s3 + $0x58] sm:$0xff]  ;;  %v59_v31 = vld [vmem:[%s1547_s0 + $0x50] sm:$0xff]  ;;  %v296_v34 = vld [vmem:[%s1550_s3 + $0x60] sm:$0xff] }
  0x1f   :  { %v1143_v32 = vpack.c.bf16 %v295_v30, %v294_v29  ;;  %v60_v33 = vld [vmem:[%s1547_s0 + $0x58] sm:$0xff]  ;;  %v297_v35 = vld [vmem:[%s1550_s3 + $0x68] sm:$0xff]  ;;  %v61_v36 = vld [vmem:[%s1547_s0 + $0x60] sm:$0xff] }
  0x20   :  { %1130 = vmatpush3.bf16.msra.mxu1 %v1127_v13  ;;  %v1147_v37 = vpack.c.bf16 %v297_v35, %v296_v34  ;;  %v62_v38 = vld [vmem:[%s1547_s0 + $0x68] sm:$0xff]  ;;  %v63_v39 = vld [vmem:[%s1547_s0 + $0x70] sm:$0xff]  ;;  %v64_v40 = vld [vmem:[%s1547_s0 + $0x78] sm:$0xff] }
  0x21   :  { %987 = vmatmul.mubr.msk.f32.gmra.mrb[2].mxu0 %vm74_vm0, %v52_v12  ;;  %1132 = vmatprep.subr.bf16.mxu1 %v1131_v17  ;;  %v298_v41 = vld [vmem:[%s1550_s3 + $0x70] sm:$0xff]  ;;  %v299_v42 = vld [vmem:[%s1550_s3 + $0x78] sm:$0xff]  ;;  %v468_v44 = vld [vmem:[#allocation3] sm:$0xff] }
  0x22   :  { %989 = vmatprep.mubr.msk.f32.mxu0 %vm74_vm0, %v53_v16  ;;  %v1151_v43 = vpack.c.bf16 %v299_v42, %v298_v41  ;;  %v469_v45 = vld [vmem:[#allocation3 + $0x8] sm:$0xff]  ;;  %v470_v46 = vld [vmem:[#allocation3 + $0x10] sm:$0xff]  ;;  %v471_v48 = vld [vmem:[#allocation3 + $0x18] sm:$0xff] }
  0x23   :  { %v1155_v47 = vpack.c.bf16 %v469_v45, %v468_v44  ;;  %v1159_v49 = vpack.c.bf16 %v471_v48, %v470_v46  ;;  %v472_v50 = vld [vmem:[#allocation3 + $0x20] sm:$0xff]  ;;  %v473_v51 = vld [vmem:[#allocation3 + $0x28] sm:$0xff]  ;;  %v474_v53 = vld [vmem:[#allocation3 + $0x30] sm:$0xff] }
  0x24   :  { %1134 = vmatpush3.bf16.msra.mxu1 %v1131_v17  ;;  %v1163_v52 = vpack.c.bf16 %v473_v51, %v472_v50  ;;  %v475_v54 = vld [vmem:[#allocation3 + $0x38] sm:$0xff]  ;;  %v476_v56 = vld [vmem:[#allocation3 + $0x40] sm:$0xff]  ;;  %v477_v57 = vld [vmem:[#allocation3 + $0x48] sm:$0xff] }
  0x25   :  { %990 = vmatmul.mubr.msk.f32.gmra.mrb[4].mxu0 %vm74_vm0, %v54_v18  ;;  %1136 = vmatprep.subr.bf16.mxu1 %v1135_v22  ;;  %v1167_v55 = vpack.c.bf16 %v475_v54, %v474_v53  ;;  %v1171_v58 = vpack.c.bf16 %v477_v57, %v476_v56  ;;  %v478_v59 = vld [vmem:[#allocation3 + $0x50] sm:$0xff]  ;;  %v479_v60 = vld [vmem:[#allocation3 + $0x58] sm:$0xff]  ;;  %v480_v62 = vld [vmem:[#allocation3 + $0x60] sm:$0xff] }
  0x26   :  { %992 = vmatprep.mubr.msk.f32.mxu0 %vm74_vm0, %v55_v21  ;;  %1156 = vmatprep.subr.bf16.mxu0 %v1155_v47  ;;  %v1175_v61 = vpack.c.bf16 %v479_v60, %v478_v59  ;;  %v481_v63 = vld [vmem:[#allocation3 + $0x68] sm:$0xff]  ;;  %v877_v1 = vld [vmem:[%s1549_s2] ss:$0 sm:$0xff]  ;;  %v482_v50 = vld [vmem:[#allocation3 + $0x70] sm:$0xff] }
  0x27   :  { %1158 = vmatpush3.bf16.msra.mxu0 %v1155_v47  ;;  %v1179_v0 = vpack.c.bf16 %v481_v63, %v480_v62  ;;  %v483_v51 = vld [vmem:[#allocation3 + $0x78] sm:$0xff] }
  0x28   :  { %1138 = vmatpush3.bf16.msra.mxu1 %v1135_v22  ;;  %1160 = vmatprep.subr.bf16.mxu0 %v1159_v49  ;;  %v894_v53 = vld [vmem:[%s1551_s4] ss:$0 sm:$0xff] }
  0x29   :  { %993 = vmatmul.mubr.msk.f32.gmra.mrb[6].mxu0 %vm74_vm0, %v56_v23  ;;  %1140 = vmatprep.subr.bf16.mxu1 %v1139_v27 }
  0x2a   :  { %995 = vmatprep.mubr.msk.f32.mxu0 %vm74_vm0, %v57_v26 }
  0x2b   :  { %1162 = vmatpush3.bf16.msra.mxu0 %v1159_v49 }
  0x2c   :  { %1142 = vmatpush3.bf16.msra.mxu1 %v1139_v27  ;;  %1164 = vmatprep.subr.bf16.mxu0 %v1163_v52 }
  0x2d   :  { %996 = vmatmul.mubr.msk.f32.gmra.mrb[8].mxu0 %vm74_vm0, %v58_v28  ;;  %1144 = vmatprep.subr.bf16.mxu1 %v1143_v32 }
  0x2e   :  { %998 = vmatprep.mubr.msk.f32.mxu0 %vm74_vm0, %v59_v31 }
  0x2f   :  { %1166 = vmatpush3.bf16.msra.mxu0 %v1163_v52  ;;  %v1183_v52 = vpack.c.bf16 %v483_v51, %v482_v50 }
  0x30   :  { %1146 = vmatpush3.bf16.msra.mxu1 %v1143_v32  ;;  %1168 = vmatprep.subr.bf16.mxu0 %v1167_v55 }
  0x31   :  { %999 = vmatmul.mubr.msk.f32.gmra.mrb[10].mxu0 %vm74_vm0, %v60_v33  ;;  %1148 = vmatprep.subr.bf16.mxu1 %v1147_v37 }
  0x32   :  { %1001 = vmatprep.mubr.msk.f32.mxu0 %vm74_vm0, %v61_v36 }
  0x33   :  { %1170 = vmatpush3.bf16.msra.mxu0 %v1167_v55 }
  0x34   :  { %1150 = vmatpush3.bf16.msra.mxu1 %v1147_v37  ;;  %1172 = vmatprep.subr.bf16.mxu0 %v1171_v58 }
  0x35   :  { %1002 = vmatmul.mubr.msk.f32.gmra.mrb[12].mxu0 %vm74_vm0, %v62_v38  ;;  %1152 = vmatprep.subr.bf16.mxu1 %v1151_v43 }
  0x36   :  { %1004 = vmatprep.mubr.msk.f32.mxu0 %vm74_vm0, %v63_v39 }
  0x37   :  { %1174 = vmatpush3.bf16.msra.mxu0 %v1171_v58 }
  0x38   :  { %1154 = vmatpush3.bf16.msra.mxu1 %v1151_v43  ;;  %1176 = vmatprep.subr.bf16.mxu0 %v1175_v61 }
  0x39   :  { %1005 = vmatmul.mubr.msk.f32.gmra.mrb[14].mxu0 %vm74_vm0, %v64_v40 }
  0x3b   :  { %1178 = vmatpush3.bf16.msra.mxu0 %v1175_v61 }
  0x3c   :  { %1180 = vmatprep.subr.bf16.mxu0 %v1179_v0 }
  0x3f   :  { %1182 = vmatpush3.bf16.msra.mxu0 %v1179_v0 }
  0x40   :  { %1184 = vmatprep.subr.bf16.mxu0 %v1183_v52 }
  0x43   :  { %1186 = vmatpush3.bf16.msra.mxu0 %v1183_v52 }
  0xf0   :  { %v985_v2 = vpop.f32.mrb[0].mxu0 }
  0xf1   :  { %v195_v3 = vadd.f32 %v985_v2, %v877_v1  ;;  %v189_v4 = vpop.f32.mrb[1].mxu0 }
  0xf2   :  { %v190_v5 = vadd.f32 %v877_v1, %v189_v4 }
  0xf3   :  { %v269_v8 = vmax.f32 %v195_v3, 0.0 }
  0xf4   :  { %v988_v6 = vpop.f32.mrb[2].mxu0  ;;  %v268_v7 = vmax.f32 %v190_v5, 0.0 }
  0xf5   :  { %v205_v9 = vadd.f32 %v988_v6, %v877_v1  ;;  %v199_v10 = vpop.f32.mrb[3].mxu0 }
  0xf6   :  { %v200_v11 = vadd.f32 %v877_v1, %v199_v10  ;;  %1039 = vmatprep.mubr.f32.mxu1 %v268_v7 }
  0xf7   :  { %1040 = vmatmul.mubr.f32.vlgmr.msra.gmra.mrb[0].mxu1 %v269_v8  ;;  %v271_v14 = vmax.f32 %v205_v9, 0.0 }
  0xf8   :  { %v270_v12 = vmax.f32 %v200_v11, 0.0  ;;  %v991_v13 = vpop.f32.mrb[4].mxu0 }
  0xf9   :  { %v215_v15 = vadd.f32 %v991_v13, %v877_v1  ;;  %v209_v16 = vpop.f32.mrb[5].mxu0 }
  0xfa   :  { %v210_v17 = vadd.f32 %v877_v1, %v209_v16  ;;  %1042 = vmatprep.mubr.f32.mxu1 %v270_v12 }
  0xfb   :  { %v273_v18 = vmax.f32 %v215_v15, 0.0  ;;  %1043 = vmatmul.mubr.f32.gmra.mrb[2].mxu1 %v271_v14 }
  0xfc   :  { %v272_v19 = vmax.f32 %v210_v17, 0.0  ;;  %v994_v20 = vpop.f32.mrb[6].mxu0 }
  0xfd   :  { %v225_v21 = vadd.f32 %v994_v20, %v877_v1  ;;  %v219_v22 = vpop.f32.mrb[7].mxu0 }
  0xfe   :  { %v220_v23 = vadd.f32 %v877_v1, %v219_v22  ;;  %1045 = vmatprep.mubr.f32.mxu1 %v272_v19 }
  0xff   :  { %v275_v24 = vmax.f32 %v225_v21, 0.0  ;;  %1046 = vmatmul.mubr.f32.gmra.mrb[4].mxu1 %v273_v18 }
 0x100   :  { %v274_v25 = vmax.f32 %v220_v23, 0.0  ;;  %v997_v26 = vpop.f32.mrb[8].mxu0 }
 0x101   :  { %v235_v27 = vadd.f32 %v997_v26, %v877_v1  ;;  %v229_v28 = vpop.f32.mrb[9].mxu0 }
 0x102   :  { %1048 = vmatprep.mubr.f32.mxu1 %v274_v25  ;;  %v230_v29 = vadd.f32 %v877_v1, %v229_v28 }
 0x103   :  { %1049 = vmatmul.mubr.f32.gmra.mrb[6].mxu1 %v275_v24  ;;  %v277_v30 = vmax.f32 %v235_v27, 0.0 }
 0x104   :  { %v276_v31 = vmax.f32 %v230_v29, 0.0  ;;  %v1000_v32 = vpop.f32.mrb[10].mxu0 }
 0x105   :  { %v245_v33 = vadd.f32 %v1000_v32, %v877_v1  ;;  %v239_v34 = vpop.f32.mrb[11].mxu0 }
 0x106   :  { %1051 = vmatprep.mubr.f32.mxu1 %v276_v31  ;;  %v240_v35 = vadd.f32 %v877_v1, %v239_v34 }
 0x107   :  { %v279_v36 = vmax.f32 %v245_v33, 0.0  ;;  %1052 = vmatmul.mubr.f32.gmra.mrb[8].mxu1 %v277_v30 }
 0x108   :  { %v278_v37 = vmax.f32 %v240_v35, 0.0  ;;  %v1003_v38 = vpop.f32.mrb[12].mxu0 }
 0x109   :  { %v255_v39 = vadd.f32 %v1003_v38, %v877_v1  ;;  %v249_v40 = vpop.f32.mrb[13].mxu0  ;;  %v1245_v38 = vmov 0  }
 0x10a   :  { %v250_v41 = vadd.f32 %v877_v1, %v249_v40  ;;  %1054 = vmatprep.mubr.f32.mxu1 %v278_v37  ;;  %1192 = vset.pattern.permute.xlu1 %v1245_v38 }
 0x10b   :  { %v281_v42 = vmax.f32 %v255_v39, 0.0  ;;  %1055 = vmatmul.mubr.f32.gmra.mrb[10].mxu1 %v279_v36  ;;  %1193 = vset.pattern.permute.xlu0 %v1245_v38  ;;  %v1439_v39 = vld [vmem:[%s1553_s6] ss:$0 sm:$0xff]  ;;  %s1246_s6 = smov [#allocation6]  }
 0x10c   :  { %v280_v43 = vmax.f32 %v250_v41, 0.0  ;;  %v1006_v44 = vpop.f32.mrb[14].mxu0 }
 0x10d   :  { %v265_v45 = vadd.f32 %v1006_v44, %v877_v1  ;;  %v259_v46 = vpop.f32.mrb[15].mxu0  ;;  %v1446_v44 = vld [vmem:[%s1554_s7] ss:$0 sm:$0xff]  ;;  %s868_s7 = sshll.u32 %s1246_s6, 4  ;;  %s869_s7 = int_to_ptr.vmem [resolvable:$true] %s868_s7 }
 0x10e   :  { %1057 = vmatprep.mubr.f32.mxu1 %v280_v43  ;;  %v260_v47 = vadd.f32 %v877_v1, %v259_v46  ;;  %s1216_s24 = scalar_lea.vmem %s869_s7, 16  ;;  %s1220_s25 = scalar_lea.vmem %s869_s7, 32 }
 0x10f   :  { %v283_v48 = vmax.f32 %v265_v45, 0.0  ;;  %1058 = vmatmul.mubr.f32.gmra.mrb[12].mxu1 %v281_v42  ;;  %p1217_p8 = scmp.ne.s32.totalorder %s869_s7, %s1216_s24  ;;  %p1221_p9 = scmp.lt.s32.totalorder %s869_s7, %s869_s7 }
 0x110   :  { %v282_v49 = vmax.f32 %v260_v47, 0.0  ;;  %p1222_p10 = scmp.lt.s32.totalorder %s1220_s25, %s1216_s24 }
 0x112   :  { %1060 = vmatprep.mubr.f32.mxu1 %v282_v49  ;;  %p1223_p11 = por %p1222_p10, %p1221_p9 }
 0x113   :  { %1061 = vmatmul.mubr.f32.gmra.mrb[14].mxu1 %v283_v48 }
 0x114   :  { %p1224_p12 = pnand %p1223_p11, %p1217_p8 }
 0x1ca   :  { %v1041_v54 = vpop.f32.mrb[0].mxu1 }
 0x1cb   :  { %v379_v55 = vadd.f32 %v1041_v54, %v894_v53  ;;  %v373_v56 = vpop.f32.mrb[1].mxu1 }
 0x1cc   :  { %v374_v57 = vadd.f32 %v894_v53, %v373_v56 }
 0x1cd   :  { %v453_v60 = vmax.f32 %v379_v55, 0.0 }
 0x1ce   :  { %v452_v58 = vmax.f32 %v374_v57, 0.0  ;;  %v1044_v59 = vpop.f32.mrb[2].mxu1 }
 0x1cf   :  { %v389_v61 = vadd.f32 %v1044_v59, %v894_v53  ;;  %v383_v62 = vpop.f32.mrb[3].mxu1 }
 0x1d0   :  { %v384_v63 = vadd.f32 %v894_v53, %v383_v62  ;;  %1095 = vmatprep.mubr.f32.mxu0 %v452_v58 }
 0x1d1   :  { %1096 = vmatmul.mubr.f32.vlgmr.msra.gmra.mrb[16].mxu0 %v453_v60  ;;  %v455_v2 = vmax.f32 %v389_v61, 0.0 }
 0x1d2   :  { %v454_v0 = vmax.f32 %v384_v63, 0.0  ;;  %v1047_v1 = vpop.f32.mrb[4].mxu1 }
 0x1d3   :  { %v399_v3 = vadd.f32 %v1047_v1, %v894_v53  ;;  %v393_v4 = vpop.f32.mrb[5].mxu1 }
 0x1d4   :  { %v394_v5 = vadd.f32 %v894_v53, %v393_v4  ;;  %1098 = vmatprep.mubr.f32.mxu0 %v454_v0 }
 0x1d5   :  { %v457_v6 = vmax.f32 %v399_v3, 0.0  ;;  %1099 = vmatmul.mubr.f32.gmra.mrb[18].mxu0 %v455_v2 }
 0x1d6   :  { %v456_v7 = vmax.f32 %v394_v5, 0.0  ;;  %v1050_v8 = vpop.f32.mrb[6].mxu1 }
 0x1d7   :  { %v409_v9 = vadd.f32 %v1050_v8, %v894_v53  ;;  %v403_v10 = vpop.f32.mrb[7].mxu1 }
 0x1d8   :  { %v404_v11 = vadd.f32 %v894_v53, %v403_v10  ;;  %1101 = vmatprep.mubr.f32.mxu0 %v456_v7 }
 0x1d9   :  { %v459_v12 = vmax.f32 %v409_v9, 0.0  ;;  %1102 = vmatmul.mubr.f32.gmra.mrb[20].mxu0 %v457_v6 }
 0x1da   :  { %v458_v13 = vmax.f32 %v404_v11, 0.0  ;;  %v1053_v14 = vpop.f32.mrb[8].mxu1 }
 0x1db   :  { %v419_v15 = vadd.f32 %v1053_v14, %v894_v53  ;;  %v413_v16 = vpop.f32.mrb[9].mxu1 }
 0x1dc   :  { %1104 = vmatprep.mubr.f32.mxu0 %v458_v13  ;;  %v414_v17 = vadd.f32 %v894_v53, %v413_v16 }
 0x1dd   :  { %1105 = vmatmul.mubr.f32.gmra.mrb[22].mxu0 %v459_v12  ;;  %v461_v18 = vmax.f32 %v419_v15, 0.0 }
 0x1de   :  { %v460_v19 = vmax.f32 %v414_v17, 0.0  ;;  %v1056_v20 = vpop.f32.mrb[10].mxu1 }
 0x1df   :  { %v429_v21 = vadd.f32 %v1056_v20, %v894_v53  ;;  %v423_v22 = vpop.f32.mrb[11].mxu1 }
 0x1e0   :  { %1107 = vmatprep.mubr.f32.mxu0 %v460_v19  ;;  %v424_v23 = vadd.f32 %v894_v53, %v423_v22 }
 0x1e1   :  { %v463_v24 = vmax.f32 %v429_v21, 0.0  ;;  %1108 = vmatmul.mubr.f32.gmra.mrb[24].mxu0 %v461_v18 }
 0x1e2   :  { %v462_v25 = vmax.f32 %v424_v23, 0.0  ;;  %v1059_v26 = vpop.f32.mrb[12].mxu1 }
 0x1e3   :  { %v439_v27 = vadd.f32 %v1059_v26, %v894_v53  ;;  %v433_v28 = vpop.f32.mrb[13].mxu1 }
 0x1e4   :  { %v434_v29 = vadd.f32 %v894_v53, %v433_v28  ;;  %1110 = vmatprep.mubr.f32.mxu0 %v462_v25 }
 0x1e5   :  { %v465_v30 = vmax.f32 %v439_v27, 0.0  ;;  %1111 = vmatmul.mubr.f32.gmra.mrb[26].mxu0 %v463_v24 }
 0x1e6   :  { %v464_v31 = vmax.f32 %v434_v29, 0.0  ;;  %v1062_v32 = vpop.f32.mrb[14].mxu1 }
 0x1e7   :  { %v449_v33 = vadd.f32 %v1062_v32, %v894_v53  ;;  %v443_v34 = vpop.f32.mrb[15].mxu1  ;;  %v653_v32 = vld [vmem:[#allocation2] sm:$0x1] }
 0x1e8   :  { %1113 = vmatprep.mubr.f32.mxu0 %v464_v31  ;;  %v444_v35 = vadd.f32 %v894_v53, %v443_v34 }
 0x1e9   :  { %v467_v36 = vmax.f32 %v449_v33, 0.0  ;;  %1114 = vmatmul.mubr.f32.gmra.mrb[28].mxu0 %v465_v30 }
 0x1ea   :  { %v466_v37 = vmax.f32 %v444_v35, 0.0 }
 0x1ec   :  { %1116 = vmatprep.mubr.f32.mxu0 %v466_v37 }
 0x1ed   :  { %1117 = vmatmul.mubr.f32.gmra.mrb[30].mxu0 %v467_v36 }
 0x2a4   :  { %v1097_v40 = vpop.f32.mrb[16].mxu0 }
 0x2a5   :  { %v563_v41 = vadd.f32 %v1097_v40, %v1439_v39  ;;  %v557_v42 = vpop.f32.mrb[17].mxu0 }
 0x2a6   :  { %v558_v43 = vadd.f32 %v1439_v39, %v557_v42 }
 0x2a7   :  { %v637_v45 = vmax.f32 %v563_v41, 0.0 }
 0x2a8   :  { %v1100_v46 = vpop.f32.mrb[18].mxu0  ;;  %v636_v47 = vmax.f32 %v558_v43, 0.0 }
 0x2a9   :  { %v573_v48 = vadd.f32 %v1100_v46, %v1439_v39  ;;  %v567_v49 = vpop.f32.mrb[19].mxu0  ;;  %v661_v50 = vmul.f32 %v1446_v44, %v637_v45 }
 0x2aa   :  { %v568_v51 = vadd.f32 %v1439_v39, %v567_v49  ;;  %v660_v58 = vmul.f32 %v1446_v44, %v636_v47 }
 0x2ab   :  { %v639_v52 = vmax.f32 %v573_v48, 0.0  ;;  %678 = vadd.xlane.f32.xlu0 %v661_v50 }
 0x2ac   :  { %v1103_v53 = vpop.f32.mrb[20].mxu0  ;;  %v638_v54 = vmax.f32 %v568_v51, 0.0 }
 0x2ad   :  { %v583_v55 = vadd.f32 %v1103_v53, %v1439_v39  ;;  %v577_v56 = vpop.f32.mrb[21].mxu0  ;;  %v663_v57 = vmul.f32 %v1446_v44, %v639_v52 }
 0x2ae   :  { %v578_v59 = vadd.f32 %v1439_v39, %v577_v56  ;;  %v662_v0 = vmul.f32 %v1446_v44, %v638_v54 }
 0x2af   :  { %682 = vadd.xlane.f32.xlu1 %v663_v57  ;;  %676 = vadd.xlane.f32.xlu0 %v660_v58  ;;  %v641_v62 = vmax.f32 %v583_v55, 0.0 }
 0x2b0   :  { %v640_v60 = vmax.f32 %v578_v59, 0.0  ;;  %v1106_v61 = vpop.f32.mrb[22].mxu0 }
 0x2b1   :  { %v593_v63 = vadd.f32 %v1106_v61, %v1439_v39  ;;  %v587_v1 = vpop.f32.mrb[23].mxu0  ;;  %v665_v7 = vmul.f32 %v1446_v44, %v641_v62 }
 0x2b2   :  { %v664_v2 = vmul.f32 %v1446_v44, %v640_v60  ;;  %v588_v3 = vadd.f32 %v1439_v39, %v587_v1 }
 0x2b3   :  { %v643_v4 = vmax.f32 %v593_v63, 0.0  ;;  %680 = vadd.xlane.f32.xlu1 %v662_v0 }
 0x2b4   :  { %684 = vadd.xlane.f32.xlu0 %v664_v2  ;;  %v642_v5 = vmax.f32 %v588_v3, 0.0  ;;  %v1109_v6 = vpop.f32.mrb[24].mxu0 }
 0x2b5   :  { %v667_v8 = vmul.f32 %v1446_v44, %v643_v4  ;;  %v603_v9 = vadd.f32 %v1109_v6, %v1439_v39  ;;  %v597_v10 = vpop.f32.mrb[25].mxu0 }
 0x2b6   :  { %v666_v12 = vmul.f32 %v1446_v44, %v642_v5  ;;  %v598_v13 = vadd.f32 %v1439_v39, %v597_v10 }
 0x2b7   :  { %686 = vadd.xlane.f32.xlu1 %v665_v7  ;;  %v645_v11 = vmax.f32 %v603_v9, 0.0 }
 0x2b8   :  { %690 = vadd.xlane.f32.xlu0 %v667_v8  ;;  %v1112_v14 = vpop.f32.mrb[26].mxu0  ;;  %v644_v18 = vmax.f32 %v598_v13, 0.0 }
 0x2b9   :  { %v613_v15 = vadd.f32 %v1112_v14, %v1439_v39  ;;  %v607_v16 = vpop.f32.mrb[27].mxu0  ;;  %v669_v19 = vmul.f32 %v1446_v44, %v645_v11 }
 0x2ba   :  { %v608_v20 = vadd.f32 %v1439_v39, %v607_v16  ;;  %v668_v25 = vmul.f32 %v1446_v44, %v644_v18 }
 0x2bb   :  { %v647_v17 = vmax.f32 %v613_v15, 0.0 }
 0x2bc   :  { %688 = vadd.xlane.f32.xlu0 %v666_v12  ;;  %v1115_v21 = vpop.f32.mrb[28].mxu0  ;;  %v646_v24 = vmax.f32 %v608_v20, 0.0 }
 0x2bd   :  { %v617_v22 = vpop.f32.mrb[29].mxu0  ;;  %v671_v23 = vmul.f32 %v1446_v44, %v647_v17  ;;  %v623_v26 = vadd.f32 %v1115_v21, %v1439_v39 }
 0x2be   :  { %v670_v30 = vmul.f32 %v1446_v44, %v646_v24  ;;  %v618_v31 = vadd.f32 %v1439_v39, %v617_v22 }
 0x2bf   :  { %v649_v29 = vmax.f32 %v623_v26, 0.0 }
 0x2c0   :  { %694 = vadd.xlane.f32.xlu0 %v669_v19  ;;  %v1118_v27 = vpop.f32.mrb[30].mxu0  ;;  %v648_v33 = vmax.f32 %v618_v31, 0.0 }
 0x2c1   :  { %v627_v28 = vpop.f32.mrb[31].mxu0  ;;  %v673_v34 = vmul.f32 %v1446_v44, %v649_v29  ;;  %v633_v36 = vadd.f32 %v1118_v27, %v1439_v39 }
 0x2c2   :  { %v628_v35 = vadd.f32 %v1439_v39, %v627_v28  ;;  %v672_v38 = vmul.f32 %v1446_v44, %v648_v33  ;;  %v713_v39 = vlaneseq }
 0x2c3   :  { %v651_v40 = vmax.f32 %v633_v36, 0.0 }
 0x2c4   :  { %692 = vadd.xlane.f32.xlu0 %v668_v25  ;;  %v650_v37 = vmax.f32 %v628_v35, 0.0  ;;  %v1478_v52 = vshrl.u32 %v713_v39, 7  ;;  %v1481_v54 = vand.u32 127, %v713_v39 }
 0x2c5   :  { %v675_v42 = vmul.f32 %v1446_v44, %v651_v40 }
 0x2c6   :  { %v674_v41 = vmul.f32 %v1446_v44, %v650_v37  ;;  %v715_v53 = vsub.s32 0, %v1478_v52  ;;  %v755_v57 = vadd.s32 4294967288, %v1481_v54  ;;  %v762_v58 = vadd.s32 4294967280, %v1481_v54 }
 0x2c7   :  { %v753_v62 = vsub.s32 %v1481_v54, %v1478_v52  ;;  %v769_v4 = vadd.s32 4294967272, %v1481_v54  ;;  %v776_v7 = vadd.s32 4294967264, %v1481_v54  ;;  %v783_v11 = vadd.s32 4294967256, %v1481_v54 }
 0x2c8   :  { %710 = vperm.xlu1 %1192, %v653_v32   ;;  %696 = vadd.xlane.f32.xlu0 %v670_v30  ;;  %v758_v63 = vsub.s32 %v755_v57, %v1478_v52  ;;  %v765_v1 = vsub.s32 %v762_v58, %v1478_v52  ;;  %v790_v17 = vadd.s32 4294967248, %v1481_v54  ;;  %v804_v26 = vadd.s32 4294967232, %v1481_v54 }
 0x2c9   :  { %v772_v10 = vsub.s32 %v769_v4, %v1478_v52  ;;  %v779_v14 = vsub.s32 %v776_v7, %v1478_v52  ;;  %v786_v20 = vsub.s32 %v783_v11, %v1478_v52  ;;  %v811_v29 = vadd.s32 4294967224, %v1481_v54 }
 0x2ca   :  { %v793_v22 = vsub.s32 %v790_v17, %v1478_v52  ;;  %v818_v36 = vadd.s32 4294967216, %v1481_v54  ;;  %v839_v39 = vadd.s32 4294967192, %v1481_v54 }
 0x2cb   :  { %v814_v40 = vsub.s32 %v811_v29, %v1478_v52 }
 0x2cc   :  { %702 = vadd.xlane.f32.xlu0 %v673_v34  ;;  %v807_v34 = vsub.s32 %v804_v26, %v1478_v52 }
 0x2d0   :  { %700 = vadd.xlane.f32.xlu0 %v672_v38 }
 0x2d4   :  { %704 = vadd.xlane.f32.xlu0 %v674_v41 }
 0x2d8   :  { %706 = vadd.xlane.f32.xlu0 %v675_v42  ;;  %v825_v42 = vadd.s32 4294967208, %v1481_v54 }
 0x2ec   :  { %698 = vadd.xlane.f32.xlu1 %v671_v23  ;;  %v797_v23 = vadd.s32 4294967240, %v1481_v54 }
 0x2ee   :  { %v800_v32 = vsub.s32 %v797_v23, %v1478_v52 }
 0x338   :  { %v679_v43 = vpop.xlane.xlu0 %678 }
 0x33c   :  { %v677_v45 = vpop.xlane.xlu0 %676  ;;  %v683_v46 = vpop.xlane.xlu1 %682 }
 0x340   :  { %v681_v48 = vpop.xlane.xlu1 %680 }
 0x341   :  { %v685_v47 = vpop.xlane.xlu0 %684 }
 0x344   :  { %v687_v50 = vpop.xlane.xlu1 %686 }
 0x345   :  { %v691_v49 = vpop.xlane.xlu0 %690 }
 0x348   :  { %v711_v55 = vpop.permute.xlu1 %710 }
 0x349   :  { %v689_v51 = vpop.xlane.xlu0 %688  ;;  %v1483_v44 = vrot.slane %v711_v55, %v715_v53  ;;  %v828_v53 = vsub.s32 %v825_v42, %v1478_v52 }
 0x34b   :  { %v717_v60 = vadd.f32 %v1483_v44, %v677_v45  ;;  %v718_v61 = vadd.f32 %v1483_v44, %v679_v43  ;;  %v719_v0 = vadd.f32 %v1483_v44, %v681_v48  ;;  %v720_v8 = vadd.f32 %v1483_v44, %v683_v46 }
 0x34c   :  { %v721_v12 = vadd.f32 %v1483_v44, %v685_v47  ;;  %v722_v18 = vadd.f32 %v1483_v44, %v687_v50  ;;  %v723_v25 = vadd.f32 %v1483_v44, %v689_v51  ;;  %v724_v31 = vadd.f32 %v1483_v44, %v691_v49 }
 0x34d   :  { %v695_v56 = vpop.xlane.xlu0 %694  ;;  %v754_v2 = vrot.slane %v717_v60, %v753_v62  ;;  %v759_v3 = vrot.slane %v718_v61, %v758_v63  ;;  %v766_v6 = vrot.slane %v719_v0, %v765_v1  ;;  %v773_v16 = vrot.slane %v720_v8, %v772_v10 }
 0x34e   :  { %v780_v21 = vrot.slane %v721_v12, %v779_v14  ;;  %v787_v28 = vrot.slane %v722_v18, %v786_v20  ;;  %v794_v33 = vrot.slane %v723_v25, %v793_v22  ;;  %v801_v41 = vrot.slane %v724_v31, %v800_v32 }
 0x34f   :  { %v761_v9 = vsel %vm760_vm1, %v759_v3, %v754_v2  ;;  %v821_v45 = vsub.s32 %v818_v36, %v1478_v52  ;;  %v832_v47 = vadd.s32 4294967200, %v1481_v54  ;;  %v726_v48 = vadd.f32 %v1483_v44, %v695_v56 }
 0x350   :  { %v768_v13 = vsel %vm767_vm2, %v766_v6, %v761_v9  ;;  %v846_v50 = vadd.s32 4294967184, %v1481_v54  ;;  %v853_v51 = vadd.s32 4294967176, %v1481_v54  ;;  %v842_v62 = vsub.s32 %v839_v39, %v1478_v52 }
 0x351   :  { %v693_v59 = vpop.xlane.xlu0 %692  ;;  %v775_v19 = vsel %vm774_vm3, %v773_v16, %v768_v13  ;;  %v835_v58 = vsub.s32 %v832_v47, %v1478_v52  ;;  %v815_v61 = vrot.slane %v726_v48, %v814_v40 }
 0x352   :  { %v782_v24 = vsel %vm781_vm4, %v780_v21, %v775_v19  ;;  %v725_v35 = vadd.f32 %v1483_v44, %v693_v59  ;;  %v849_v54 = vsub.s32 %v846_v50, %v1478_v52  ;;  %v856_v2 = vsub.s32 %v853_v51, %v1478_v52 }
 0x353   :  { %v789_v30 = vsel %vm788_vm5, %v787_v28, %v782_v24 }
 0x354   :  { %v796_v37 = vsel %vm795_vm6, %v794_v33, %v789_v30  ;;  %v808_v43 = vrot.slane %v725_v35, %v807_v34 }
 0x355   :  { %v697_v5 = vpop.xlane.xlu0 %696  ;;  %v803_v49 = vsel %vm802_vm7, %v801_v41, %v796_v37 }
 0x356   :  { %v727_v46 = vadd.f32 %v1483_v44, %v697_v5  ;;  %v810_v55 = vsel %vm809_vm8, %v808_v43, %v803_v49 }
 0x357   :  { %v817_v3 = vsel %vm816_vm9, %v815_v61, %v810_v55 }
 0x358   :  { %v822_v57 = vrot.slane %v727_v46, %v821_v45 }
 0x359   :  { %v703_v15 = vpop.xlane.xlu0 %702 }
 0x35a   :  { %v730_v63 = vadd.f32 %v1483_v44, %v703_v15  ;;  %v824_v6 = vsel %vm823_vm10, %v822_v57, %v817_v3 }
 0x35c   :  { %v843_v8 = vrot.slane %v730_v63, %v842_v62 }
 0x35d   :  { %v701_v27 = vpop.xlane.xlu0 %700 }
 0x35e   :  { %v729_v59 = vadd.f32 %v1483_v44, %v701_v27 }
 0x360   :  { %v836_v7 = vrot.slane %v729_v59, %v835_v58 }
 0x361   :  { %v705_v38 = vpop.xlane.xlu0 %704 }
 0x362   :  { %v731_v1 = vadd.f32 %v1483_v44, %v705_v38 }
 0x364   :  { %v850_v10 = vrot.slane %v731_v1, %v849_v54 }
 0x365   :  { %v707_v60 = vpop.xlane.xlu0 %706 }
 0x366   :  { %v732_v4 = vadd.f32 %v1483_v44, %v707_v60 }
 0x368   :  { %v857_v52 = vrot.slane %v732_v4, %v856_v2 }
 0x379   :  { %v699_v56 = vpop.xlane.xlu1 %698 }
 0x37a   :  { %v728_v0 = vadd.f32 %v1483_v44, %v699_v56 }
 0x37c   :  { %v829_v5 = vrot.slane %v728_v0, %v828_v53 }
 0x37e   :  { %v831_v9 = vsel %vm830_vm11, %v829_v5, %v824_v6 }
 0x37f   :  { %v838_v11 = vsel %vm837_vm12, %v836_v7, %v831_v9 }
 0x380   :  { %v845_v12 = vsel %vm844_vm13, %v843_v8, %v838_v11 }
 0x381   :  { %v852_v13 = vsel %vm851_vm14, %v850_v10, %v845_v12 }
 0x382   :  { %v859_v14 = vsel %vm858_vm15, %v857_v52, %v852_v13 }
 0x383   :  { %861 = vst [vmem:[#allocation6] sm:$0x1] %v859_v14 }
 0x384   :  { %1227 = shalt.err (!%p1224_p12)
}
 0x385   :  { %s1228_s28 = scalar_lea.hbm %s1556_s9, 16 }
 0x386   :  { %p1229_p13 = scmp.ne.s32.totalorder %s1556_s9, %s1228_s28  ;;  %p1232_p0 = scmp.lt.u32.totalorder %s1228_s28, %s1556_s9 }
 0x388   :  { %p1234_p1 = pnand %p1232_p0, %p1229_p13 }
 0x38a   :  { %1237 = shalt.err (!%p1234_p1)
}
 0x38b   :  { %871 = dma.vmem_to_hbm [thread:$0]  %s869_s7, 16, %s1556_s9, [#allocation5]  }
 0x38c   :  { %1240 = dma.done.wait [#allocation5], 16  }
 0x38d   :  { %1241 = vsyncadd [#allocation5], 4294967280 }
 0x38e   :  { %875 = vsyncpa [#allocation4], 1 }
 0x38f   :  { %876 = vsyncpa [#allocation5], 1 }

// kernel: tpu_custom_call.1
= control target key start
LH: loop header
LB: loop body
LE: loop exit
PB: predicated region body
PF: predicated region fallthrough
CT: control target
= control target key end

     0   :  { %s1547_s0 = inlined_call_operand.vmem [shape: f32[128,16], index: 0, kind: input, shape index: {}]   ;;  %s1548_s1 = inlined_call_operand.vmem [shape: f32[16,128], index: 1, kind: input, shape index: {}]   ;;  %s1549_s2 = inlined_call_operand.vmem [shape: f32[1,128], index: 2, kind: input, shape index: {}]   ;;  %s1550_s3 = inlined_call_operand.vmem [shape: f32[128,128], index: 3, kind: input, shape index: {}]   ;;  %s1551_s4 = inlined_call_operand.vmem [shape: f32[1,128], index: 4, kind: input, shape index: {}]   ;;  %s1552_s5 = inlined_call_operand.hbm [shape: f32[128,128], index: 5, kind: input, shape index: {}]   ;;  %s1553_s6 = inlined_call_operand.vmem [shape: f32[1,128], index: 6, kind: input, shape index: {}]   ;;  %s1554_s7 = inlined_call_operand.vmem [shape: f32[1,128], index: 7, kind: input, shape index: {}]   ;;  %s1555_s8 = inlined_call_operand.<no memory space> [shape: f32[1,1], index: 8, kind: input, shape index: {}]   ;;  %s1556_s9 = inlined_call_operand.hbm [shape: f32[1,1,128], index: 9, kind: output, shape index: {}]  }
   0x1   :  { %v14_v0 = vstv %s1555_s8 }
   0x2   :  { %15 = vst [vmem:[#allocation2] sm:$0x1] %v14_v0 }
   0x3   :  { %16 = vsyncpa [#allocation4], 0 }
   0x4   :  { %17 = vsyncpa [#allocation5], 0  ;;  %s1242_s11 = smov [#allocation3]   ;;  %s1194_s15 = scalar_lea.hbm %s1552_s5, 2048 }
   0x5   :  { %s33_s12 = sshll.u32 %s1242_s11, 4  ;;  %p1195_p0 = scmp.ne.s32.totalorder %s1552_s5, %s1194_s15  ;;  %s34_s12 = int_to_ptr.vmem [resolvable:$true] %s33_s12 }
   0x6   :  { %p1198_p1 = scmp.lt.u32.totalorder %s1194_s15, %s1552_s5 }
   0x8   :  { %p1200_p2 = pnand %p1198_p1, %p1195_p0 }
   0xa   :  { %1203 = shalt.err (!%p1200_p2)
}
   0xb   :  { %s1204_s8 = scalar_lea.vmem %s34_s12, 2048  ;;  %p1209_p4 = scmp.lt.s32.totalorder %s34_s12, %s34_s12 }
   0xc   :  { %p1205_p3 = scmp.ne.s32.totalorder %s34_s12, %s1204_s8  ;;  %p1210_p5 = scmp.lt.s32.totalorder %s1204_s8, %s1204_s8 }
   0xe   :  { %p1211_p6 = por %p1210_p5, %p1209_p4 }
  0x10   :  { %p1212_p7 = pnand %p1211_p6, %p1205_p3 }
  0x12   :  { %1215 = shalt.err (!%p1212_p7)
}
  0x13   :  { %s1243_s20 = smov 128   ;;  %s1244_s21 = smov 8  }
  0x14   :  { %39 = dma.hbm_to_vmem [thread:$0]  %s1552_s5, 2048, %s34_s12, [#allocation4], %s1243_s20, %s1243_s20, %s1244_s21  }
  0x15   :  { %1238 = dma.done.wait [#allocation4], 2048  }
  0x16   :  { %1239 = vsyncadd [#allocation4], 4294965248  ;;  %vm74_vm0 = vcmask 130048   ;;  %v65_v1 = vld [vmem:[%s1548_s1] sm:$0xff]  ;;  %v66_v2 = vld [vmem:[%s1548_s1 + $0x8] sm:$0xff]  ;;  %vm760_vm1 = vcmask 130112  }
  0x17   :  { %v49_v3 = vld [vmem:[%s1547_s0] sm:$0xff]  ;;  %v1119_v4 = vpack.c.bf16 %v66_v2, %v65_v1  ;;  %v50_v5 = vld [vmem:[%s1547_s0 + $0x8] sm:$0xff]  ;;  %v51_v6 = vld [vmem:[%s1547_s0 + $0x10] sm:$0xff]  ;;  %vm767_vm2 = vcmask 195712   ;;  %vm774_vm3 = vcmask 261312   ;;  %vm781_vm4 = vcmask 326912  }
  0x18   :  { %983 = vmatprep.mubr.msk.f32.mxu0 %vm74_vm0, %v49_v3  ;;  %v284_v7 = vld [vmem:[%s1550_s3] sm:$0xff]  ;;  %v285_v8 = vld [vmem:[%s1550_s3 + $0x8] sm:$0xff]  ;;  %v286_v9 = vld [vmem:[%s1550_s3 + $0x10] sm:$0xff]  ;;  %vm788_vm5 = vcmask 392512   ;;  %vm795_vm6 = vcmask 458112   ;;  %vm802_vm7 = vcmask 523712  }
  0x19   :  { %1120 = vmatprep.subr.bf16.mxu0 %v1119_v4  ;;  %v1123_v10 = vpack.c.bf16 %v285_v8, %v284_v7  ;;  %v287_v11 = vld [vmem:[%s1550_s3 + $0x18] sm:$0xff]  ;;  %v288_v14 = vld [vmem:[%s1550_s3 + $0x20] sm:$0xff]  ;;  %v289_v15 = vld [vmem:[%s1550_s3 + $0x28] sm:$0xff]  ;;  %vm809_vm8 = vcmask 589312   ;;  %vm816_vm9 = vcmask 654912   ;;  %vm823_vm10 = vcmask 720512  }
  0x1a   :  { %1122 = vmatpush3.bf16.msra.mxu0 %v1119_v4  ;;  %v52_v12 = vld [vmem:[%s1547_s0 + $0x18] sm:$0xff]  ;;  %v1127_v13 = vpack.c.bf16 %v287_v11, %v286_v9  ;;  %v53_v16 = vld [vmem:[%s1547_s0 + $0x20] sm:$0xff]  ;;  %v1131_v17 = vpack.c.bf16 %v289_v15, %v288_v14  ;;  %v54_v18 = vld [vmem:[%s1547_s0 + $0x28] sm:$0xff]  ;;  %vm830_vm11 = vcmask 786112   ;;  %vm837_vm12 = vcmask 851712  }
  0x1b   :  { %1124 = vmatprep.subr.bf16.mxu1 %v1123_v10  ;;  %v290_v19 = vld [vmem:[%s1550_s3 + $0x30] sm:$0xff]  ;;  %v291_v20 = vld [vmem:[%s1550_s3 + $0x38] sm:$0xff]  ;;  %v292_v24 = vld [vmem:[%s1550_s3 + $0x40] sm:$0xff]  ;;  %vm844_vm13 = vcmask 917312   ;;  %vm851_vm14 = vcmask 982912   ;;  %vm858_vm15 = vcmask 1048512  }
  0x1c   :  { %1126 = vmatpush3.bf16.msra.mxu1 %v1123_v10  ;;  %v55_v21 = vld [vmem:[%s1547_s0 + $0x30] sm:$0xff]  ;;  %v1135_v22 = vpack.c.bf16 %v291_v20, %v290_v19  ;;  %v56_v23 = vld [vmem:[%s1547_s0 + $0x38] sm:$0xff]  ;;  %v293_v25 = vld [vmem:[%s1550_s3 + $0x48] sm:$0xff] }
  0x1d   :  { %984 = vmatmul.mubr.msk.f32.vlgmr.msra.gmra.mrb[0].mxu0 %vm74_vm0, %v50_v5  ;;  %1128 = vmatprep.subr.bf16.mxu1 %v1127_v13  ;;  %v57_v26 = vld [vmem:[%s1547_s0 + $0x40] sm:$0xff]  ;;  %v1139_v27 = vpack.c.bf16 %v293_v25, %v292_v24  ;;  %v58_v28 = vld [vmem:[%s1547_s0 + $0x48] sm:$0xff]  ;;  %v294_v29 = vld [vmem:[%s1550_s3 + $0x50] sm:$0xff] }
  0x1e   :  { %986 = vmatprep.mubr.msk.f32.mxu0 %vm74_vm0, %v51_v6  ;;  %v295_v30 = vld [vmem:[%s1550_s3 + $0x58] sm:$0xff]  ;;  %v59_v31 = vld [vmem:[%s1547_s0 + $0x50] sm:$0xff]  ;;  %v296_v34 = vld [vmem:[%s1550_s3 + $0x60] sm:$0xff] }
  0x1f   :  { %v1143_v32 = vpack.c.bf16 %v295_v30, %v294_v29  ;;  %v60_v33 = vld [vmem:[%s1547_s0 + $0x58] sm:$0xff]  ;;  %v297_v35 = vld [vmem:[%s1550_s3 + $0x68] sm:$0xff]  ;;  %v61_v36 = vld [vmem:[%s1547_s0 + $0x60] sm:$0xff] }
  0x20   :  { %1130 = vmatpush3.bf16.msra.mxu1 %v1127_v13  ;;  %v1147_v37 = vpack.c.bf16 %v297_v35, %v296_v34  ;;  %v62_v38 = vld [vmem:[%s1547_s0 + $0x68] sm:$0xff]  ;;  %v63_v39 = vld [vmem:[%s1547_s0 + $0x70] sm:$0xff]  ;;  %v64_v40 = vld [vmem:[%s1547_s0 + $0x78] sm:$0xff] }
  0x21   :  { %987 = vmatmul.mubr.msk.f32.gmra.mrb[2].mxu0 %vm74_vm0, %v52_v12  ;;  %1132 = vmatprep.subr.bf16.mxu1 %v1131_v17  ;;  %v298_v41 = vld [vmem:[%s1550_s3 + $0x70] sm:$0xff]  ;;  %v299_v42 = vld [vmem:[%s1550_s3 + $0x78] sm:$0xff]  ;;  %v468_v44 = vld [vmem:[#allocation3] sm:$0xff] }
  0x22   :  { %989 = vmatprep.mubr.msk.f32.mxu0 %vm74_vm0, %v53_v16  ;;  %v1151_v43 = vpack.c.bf16 %v299_v42, %v298_v41  ;;  %v469_v45 = vld [vmem:[#allocation3 + $0x8] sm:$0xff]  ;;  %v470_v46 = vld [vmem:[#allocation3 + $0x10] sm:$0xff]  ;;  %v471_v48 = vld [vmem:[#allocation3 + $0x18] sm:$0xff] }
  0x23   :  { %v1155_v47 = vpack.c.bf16 %v469_v45, %v468_v44  ;;  %v1159_v49 = vpack.c.bf16 %v471_v48, %v470_v46  ;;  %v472_v50 = vld [vmem:[#allocation3 + $0x20] sm:$0xff]  ;;  %v473_v51 = vld [vmem:[#allocation3 + $0x28] sm:$0xff]  ;;  %v474_v53 = vld [vmem:[#allocation3 + $0x30] sm:$0xff] }
  0x24   :  { %1134 = vmatpush3.bf16.msra.mxu1 %v1131_v17  ;;  %v1163_v52 = vpack.c.bf16 %v473_v51, %v472_v50  ;;  %v475_v54 = vld [vmem:[#allocation3 + $0x38] sm:$0xff]  ;;  %v476_v56 = vld [vmem:[#allocation3 + $0x40] sm:$0xff]  ;;  %v477_v57 = vld [vmem:[#allocation3 + $0x48] sm:$0xff] }
  0x25   :  { %990 = vmatmul.mubr.msk.f32.gmra.mrb[4].mxu0 %vm74_vm0, %v54_v18  ;;  %1136 = vmatprep.subr.bf16.mxu1 %v1135_v22  ;;  %v1167_v55 = vpack.c.bf16 %v475_v54, %v474_v53  ;;  %v1171_v58 = vpack.c.bf16 %v477_v57, %v476_v56  ;;  %v478_v59 = vld [vmem:[#allocation3 + $0x50] sm:$0xff]  ;;  %v479_v60 = vld [vmem:[#allocation3 + $0x58] sm:$0xff]  ;;  %v480_v62 = vld [vmem:[#allocation3 + $0x60] sm:$0xff] }
  0x26   :  { %992 = vmatprep.mubr.msk.f32.mxu0 %vm74_vm0, %v55_v21  ;;  %1156 = vmatprep.subr.bf16.mxu0 %v1155_v47  ;;  %v1175_v61 = vpack.c.bf16 %v479_v60, %v478_v59  ;;  %v481_v63 = vld [vmem:[#allocation3 + $0x68] sm:$0xff]  ;;  %v877_v1 = vld [vmem:[%s1549_s2] ss:$0 sm:$0xff]  ;;  %v482_v50 = vld [vmem:[#allocation3 + $0x70] sm:$0xff] }
  0x27   :  { %1158 = vmatpush3.bf16.msra.mxu0 %v1155_v47  ;;  %v1179_v0 = vpack.c.bf16 %v481_v63, %v480_v62  ;;  %v483_v51 = vld [vmem:[#allocation3 + $0x78] sm:$0xff] }
  0x28   :  { %1138 = vmatpush3.bf16.msra.mxu1 %v1135_v22  ;;  %1160 = vmatprep.subr.bf16.mxu0 %v1159_v49  ;;  %v894_v53 = vld [vmem:[%s1551_s4] ss:$0 sm:$0xff] }
  0x29   :  { %993 = vmatmul.mubr.msk.f32.gmra.mrb[6].mxu0 %vm74_vm0, %v56_v23  ;;  %1140 = vmatprep.subr.bf16.mxu1 %v1139_v27 }
  0x2a   :  { %995 = vmatprep.mubr.msk.f32.mxu0 %vm74_vm0, %v57_v26 }
  0x2b   :  { %1162 = vmatpush3.bf16.msra.mxu0 %v1159_v49 }
  0x2c   :  { %1142 = vmatpush3.bf16.msra.mxu1 %v1139_v27  ;;  %1164 = vmatprep.subr.bf16.mxu0 %v1163_v52 }
  0x2d   :  { %996 = vmatmul.mubr.msk.f32.gmra.mrb[8].mxu0 %vm74_vm0, %v58_v28  ;;  %1144 = vmatprep.subr.bf16.mxu1 %v1143_v32 }
  0x2e   :  { %998 = vmatprep.mubr.msk.f32.mxu0 %vm74_vm0, %v59_v31 }
  0x2f   :  { %1166 = vmatpush3.bf16.msra.mxu0 %v1163_v52  ;;  %v1183_v52 = vpack.c.bf16 %v483_v51, %v482_v50 }
  0x30   :  { %1146 = vmatpush3.bf16.msra.mxu1 %v1143_v32  ;;  %1168 = vmatprep.subr.bf16.mxu0 %v1167_v55 }
  0x31   :  { %999 = vmatmul.mubr.msk.f32.gmra.mrb[10].mxu0 %vm74_vm0, %v60_v33  ;;  %1148 = vmatprep.subr.bf16.mxu1 %v1147_v37 }
  0x32   :  { %1001 = vmatprep.mubr.msk.f32.mxu0 %vm74_vm0, %v61_v36 }
  0x33   :  { %1170 = vmatpush3.bf16.msra.mxu0 %v1167_v55 }
  0x34   :  { %1150 = vmatpush3.bf16.msra.mxu1 %v1147_v37  ;;  %1172 = vmatprep.subr.bf16.mxu0 %v1171_v58 }
  0x35   :  { %1002 = vmatmul.mubr.msk.f32.gmra.mrb[12].mxu0 %vm74_vm0, %v62_v38  ;;  %1152 = vmatprep.subr.bf16.mxu1 %v1151_v43 }
  0x36   :  { %1004 = vmatprep.mubr.msk.f32.mxu0 %vm74_vm0, %v63_v39 }
  0x37   :  { %1174 = vmatpush3.bf16.msra.mxu0 %v1171_v58 }
  0x38   :  { %1154 = vmatpush3.bf16.msra.mxu1 %v1151_v43  ;;  %1176 = vmatprep.subr.bf16.mxu0 %v1175_v61 }
  0x39   :  { %1005 = vmatmul.mubr.msk.f32.gmra.mrb[14].mxu0 %vm74_vm0, %v64_v40 }
  0x3b   :  { %1178 = vmatpush3.bf16.msra.mxu0 %v1175_v61 }
  0x3c   :  { %1180 = vmatprep.subr.bf16.mxu0 %v1179_v0 }
  0x3f   :  { %1182 = vmatpush3.bf16.msra.mxu0 %v1179_v0 }
  0x40   :  { %1184 = vmatprep.subr.bf16.mxu0 %v1183_v52 }
  0x43   :  { %1186 = vmatpush3.bf16.msra.mxu0 %v1183_v52 }
  0xf0   :  { %v985_v2 = vpop.f32.mrb[0].mxu0 }
  0xf1   :  { %v195_v3 = vadd.f32 %v985_v2, %v877_v1  ;;  %v189_v4 = vpop.f32.mrb[1].mxu0 }
  0xf2   :  { %v190_v5 = vadd.f32 %v877_v1, %v189_v4 }
  0xf3   :  { %v269_v8 = vmax.f32 %v195_v3, 0.0 }
  0xf4   :  { %v988_v6 = vpop.f32.mrb[2].mxu0  ;;  %v268_v7 = vmax.f32 %v190_v5, 0.0 }
  0xf5   :  { %v205_v9 = vadd.f32 %v988_v6, %v877_v1  ;;  %v199_v10 = vpop.f32.mrb[3].mxu0 }
  0xf6   :  { %v200_v11 = vadd.f32 %v877_v1, %v199_v10  ;;  %1039 = vmatprep.mubr.f32.mxu1 %v268_v7 }
  0xf7   :  { %1040 = vmatmul.mubr.f32.vlgmr.msra.gmra.mrb[0].mxu1 %v269_v8  ;;  %v271_v14 = vmax.f32 %v205_v9, 0.0 }
  0xf8   :  { %v270_v12 = vmax.f32 %v200_v11, 0.0  ;;  %v991_v13 = vpop.f32.mrb[4].mxu0 }
  0xf9   :  { %v215_v15 = vadd.f32 %v991_v13, %v877_v1  ;;  %v209_v16 = vpop.f32.mrb[5].mxu0 }
  0xfa   :  { %v210_v17 = vadd.f32 %v877_v1, %v209_v16  ;;  %1042 = vmatprep.mubr.f32.mxu1 %v270_v12 }
  0xfb   :  { %v273_v18 = vmax.f32 %v215_v15, 0.0  ;;  %1043 = vmatmul.mubr.f32.gmra.mrb[2].mxu1 %v271_v14 }
  0xfc   :  { %v272_v19 = vmax.f32 %v210_v17, 0.0  ;;  %v994_v20 = vpop.f32.mrb[6].mxu0 }
  0xfd   :  { %v225_v21 = vadd.f32 %v994_v20, %v877_v1  ;;  %v219_v22 = vpop.f32.mrb[7].mxu0 }
  0xfe   :  { %v220_v23 = vadd.f32 %v877_v1, %v219_v22  ;;  %1045 = vmatprep.mubr.f32.mxu1 %v272_v19 }
  0xff   :  { %v275_v24 = vmax.f32 %v225_v21, 0.0  ;;  %1046 = vmatmul.mubr.f32.gmra.mrb[4].mxu1 %v273_v18 }
 0x100   :  { %v274_v25 = vmax.f32 %v220_v23, 0.0  ;;  %v997_v26 = vpop.f32.mrb[8].mxu0 }
 0x101   :  { %v235_v27 = vadd.f32 %v997_v26, %v877_v1  ;;  %v229_v28 = vpop.f32.mrb[9].mxu0 }
 0x102   :  { %1048 = vmatprep.mubr.f32.mxu1 %v274_v25  ;;  %v230_v29 = vadd.f32 %v877_v1, %v229_v28 }
 0x103   :  { %1049 = vmatmul.mubr.f32.gmra.mrb[6].mxu1 %v275_v24  ;;  %v277_v30 = vmax.f32 %v235_v27, 0.0 }
 0x104   :  { %v276_v31 = vmax.f32 %v230_v29, 0.0  ;;  %v1000_v32 = vpop.f32.mrb[10].mxu0 }
 0x105   :  { %v245_v33 = vadd.f32 %v1000_v32, %v877_v1  ;;  %v239_v34 = vpop.f32.mrb[11].mxu0 }
 0x106   :  { %1051 = vmatprep.mubr.f32.mxu1 %v276_v31  ;;  %v240_v35 = vadd.f32 %v877_v1, %v239_v34 }
 0x107   :  { %v279_v36 = vmax.f32 %v245_v33, 0.0  ;;  %1052 = vmatmul.mubr.f32.gmra.mrb[8].mxu1 %v277_v30 }
 0x108   :  { %v278_v37 = vmax.f32 %v240_v35, 0.0  ;;  %v1003_v38 = vpop.f32.mrb[12].mxu0 }
 0x109   :  { %v255_v39 = vadd.f32 %v1003_v38, %v877_v1  ;;  %v249_v40 = vpop.f32.mrb[13].mxu0  ;;  %v1245_v38 = vmov 0  }
 0x10a   :  { %v250_v41 = vadd.f32 %v877_v1, %v249_v40  ;;  %1054 = vmatprep.mubr.f32.mxu1 %v278_v37  ;;  %1192 = vset.pattern.permute.xlu1 %v1245_v38 }
 0x10b   :  { %v281_v42 = vmax.f32 %v255_v39, 0.0  ;;  %1055 = vmatmul.mubr.f32.gmra.mrb[10].mxu1 %v279_v36  ;;  %1193 = vset.pattern.permute.xlu0 %v1245_v38  ;;  %v1439_v39 = vld [vmem:[%s1553_s6] ss:$0 sm:$0xff]  ;;  %s1246_s6 = smov [#allocation6]  }
 0x10c   :  { %v280_v43 = vmax.f32 %v250_v41, 0.0  ;;  %v1006_v44 = vpop.f32.mrb[14].mxu0 }
 0x10d   :  { %v265_v45 = vadd.f32 %v1006_v44, %v877_v1  ;;  %v259_v46 = vpop.f32.mrb[15].mxu0  ;;  %v1446_v44 = vld [vmem:[%s1554_s7] ss:$0 sm:$0xff]  ;;  %s868_s7 = sshll.u32 %s1246_s6, 4  ;;  %s869_s7 = int_to_ptr.vmem [resolvable:$true] %s868_s7 }
 0x10e   :  { %1057 = vmatprep.mubr.f32.mxu1 %v280_v43  ;;  %v260_v47 = vadd.f32 %v877_v1, %v259_v46  ;;  %s1216_s24 = scalar_lea.vmem %s869_s7, 16  ;;  %s1220_s25 = scalar_lea.vmem %s869_s7, 32 }
 0x10f   :  { %v283_v48 = vmax.f32 %v265_v45, 0.0  ;;  %1058 = vmatmul.mubr.f32.gmra.mrb[12].mxu1 %v281_v42  ;;  %p1217_p8 = scmp.ne.s32.totalorder %s869_s7, %s1216_s24  ;;  %p1221_p9 = scmp.lt.s32.totalorder %s869_s7, %s869_s7 }
 0x110   :  { %v282_v49 = vmax.f32 %v260_v47, 0.0  ;;  %p1222_p10 = scmp.lt.s32.totalorder %s1220_s25, %s1216_s24 }
 0x112   :  { %1060 = vmatprep.mubr.f32.mxu1 %v282_v49  ;;  %p1223_p11 = por %p1222_p10, %p1221_p9 }
 0x113   :  { %1061 = vmatmul.mubr.f32.gmra.mrb[14].mxu1 %v283_v48 }
 0x114   :  { %p1224_p12 = pnand %p1223_p11, %p1217_p8 }
 0x1ca   :  { %v1041_v54 = vpop.f32.mrb[0].mxu1 }
 0x1cb   :  { %v379_v55 = vadd.f32 %v1041_v54, %v894_v53  ;;  %v373_v56 = vpop.f32.mrb[1].mxu1 }
 0x1cc   :  { %v374_v57 = vadd.f32 %v894_v53, %v373_v56 }
 0x1cd   :  { %v453_v60 = vmax.f32 %v379_v55, 0.0 }
 0x1ce   :  { %v452_v58 = vmax.f32 %v374_v57, 0.0  ;;  %v1044_v59 = vpop.f32.mrb[2].mxu1 }
 0x1cf   :  { %v389_v61 = vadd.f32 %v1044_v59, %v894_v53  ;;  %v383_v62 = vpop.f32.mrb[3].mxu1 }
 0x1d0   :  { %v384_v63 = vadd.f32 %v894_v53, %v383_v62  ;;  %1095 = vmatprep.mubr.f32.mxu0 %v452_v58 }
 0x1d1   :  { %1096 = vmatmul.mubr.f32.vlgmr.msra.gmra.mrb[16].mxu0 %v453_v60  ;;  %v455_v2 = vmax.f32 %v389_v61, 0.0 }
 0x1d2   :  { %v454_v0 = vmax.f32 %v384_v63, 0.0  ;;  %v1047_v1 = vpop.f32.mrb[4].mxu1 }
 0x1d3   :  { %v399_v3 = vadd.f32 %v1047_v1, %v894_v53  ;;  %v393_v4 = vpop.f32.mrb[5].mxu1 }
 0x1d4   :  { %v394_v5 = vadd.f32 %v894_v53, %v393_v4  ;;  %1098 = vmatprep.mubr.f32.mxu0 %v454_v0 }
 0x1d5   :  { %v457_v6 = vmax.f32 %v399_v3, 0.0  ;;  %1099 = vmatmul.mubr.f32.gmra.mrb[18].mxu0 %v455_v2 }
 0x1d6   :  { %v456_v7 = vmax.f32 %v394_v5, 0.0  ;;  %v1050_v8 = vpop.f32.mrb[6].mxu1 }
 0x1d7   :  { %v409_v9 = vadd.f32 %v1050_v8, %v894_v53  ;;  %v403_v10 = vpop.f32.mrb[7].mxu1 }
 0x1d8   :  { %v404_v11 = vadd.f32 %v894_v53, %v403_v10  ;;  %1101 = vmatprep.mubr.f32.mxu0 %v456_v7 }
 0x1d9   :  { %v459_v12 = vmax.f32 %v409_v9, 0.0  ;;  %1102 = vmatmul.mubr.f32.gmra.mrb[20].mxu0 %v457_v6 }
 0x1da   :  { %v458_v13 = vmax.f32 %v404_v11, 0.0  ;;  %v1053_v14 = vpop.f32.mrb[8].mxu1 }
 0x1db   :  { %v419_v15 = vadd.f32 %v1053_v14, %v894_v53  ;;  %v413_v16 = vpop.f32.mrb[9].mxu1 }
 0x1dc   :  { %1104 = vmatprep.mubr.f32.mxu0 %v458_v13  ;;  %v414_v17 = vadd.f32 %v894_v53, %v413_v16 }
 0x1dd   :  { %1105 = vmatmul.mubr.f32.gmra.mrb[22].mxu0 %v459_v12  ;;  %v461_v18 = vmax.f32 %v419_v15, 0.0 }
 0x1de   :  { %v460_v19 = vmax.f32 %v414_v17, 0.0  ;;  %v1056_v20 = vpop.f32.mrb[10].mxu1 }
 0x1df   :  { %v429_v21 = vadd.f32 %v1056_v20, %v894_v53  ;;  %v423_v22 = vpop.f32.mrb[11].mxu1 }
 0x1e0   :  { %1107 = vmatprep.mubr.f32.mxu0 %v460_v19  ;;  %v424_v23 = vadd.f32 %v894_v53, %v423_v22 }
 0x1e1   :  { %v463_v24 = vmax.f32 %v429_v21, 0.0  ;;  %1108 = vmatmul.mubr.f32.gmra.mrb[24].mxu0 %v461_v18 }
 0x1e2   :  { %v462_v25 = vmax.f32 %v424_v23, 0.0  ;;  %v1059_v26 = vpop.f32.mrb[12].mxu1 }
 0x1e3   :  { %v439_v27 = vadd.f32 %v1059_v26, %v894_v53  ;;  %v433_v28 = vpop.f32.mrb[13].mxu1 }
 0x1e4   :  { %v434_v29 = vadd.f32 %v894_v53, %v433_v28  ;;  %1110 = vmatprep.mubr.f32.mxu0 %v462_v25 }
 0x1e5   :  { %v465_v30 = vmax.f32 %v439_v27, 0.0  ;;  %1111 = vmatmul.mubr.f32.gmra.mrb[26].mxu0 %v463_v24 }
 0x1e6   :  { %v464_v31 = vmax.f32 %v434_v29, 0.0  ;;  %v1062_v32 = vpop.f32.mrb[14].mxu1 }
 0x1e7   :  { %v449_v33 = vadd.f32 %v1062_v32, %v894_v53  ;;  %v443_v34 = vpop.f32.mrb[15].mxu1  ;;  %v653_v32 = vld [vmem:[#allocation2] sm:$0x1] }
 0x1e8   :  { %1113 = vmatprep.mubr.f32.mxu0 %v464_v31  ;;  %v444_v35 = vadd.f32 %v894_v53, %v443_v34 }
 0x1e9   :  { %v467_v36 = vmax.f32 %v449_v33, 0.0  ;;  %1114 = vmatmul.mubr.f32.gmra.mrb[28].mxu0 %v465_v30 }
 0x1ea   :  { %v466_v37 = vmax.f32 %v444_v35, 0.0 }
 0x1ec   :  { %1116 = vmatprep.mubr.f32.mxu0 %v466_v37 }
 0x1ed   :  { %1117 = vmatmul.mubr.f32.gmra.mrb[30].mxu0 %v467_v36 }
 0x2a4   :  { %v1097_v40 = vpop.f32.mrb[16].mxu0 }
 0x2a5   :  { %v563_v41 = vadd.f32 %v1097_v40, %v1439_v39  ;;  %v557_v42 = vpop.f32.mrb[17].mxu0 }
 0x2a6   :  { %v558_v43 = vadd.f32 %v1439_v39, %v557_v42 }
 0x2a7   :  { %v637_v45 = vmax.f32 %v563_v41, 0.0 }
 0x2a8   :  { %v1100_v46 = vpop.f32.mrb[18].mxu0  ;;  %v636_v47 = vmax.f32 %v558_v43, 0.0 }
 0x2a9   :  { %v573_v48 = vadd.f32 %v1100_v46, %v1439_v39  ;;  %v567_v49 = vpop.f32.mrb[19].mxu0  ;;  %v661_v50 = vmul.f32 %v1446_v44, %v637_v45 }
 0x2aa   :  { %v568_v51 = vadd.f32 %v1439_v39, %v567_v49  ;;  %v660_v58 = vmul.f32 %v1446_v44, %v636_v47 }
 0x2ab   :  { %v639_v52 = vmax.f32 %v573_v48, 0.0  ;;  %678 = vadd.xlane.f32.xlu0 %v661_v50 }
 0x2ac   :  { %v1103_v53 = vpop.f32.mrb[20].mxu0  ;;  %v638_v54 = vmax.f32 %v568_v51, 0.0 }
 0x2ad   :  { %v583_v55 = vadd.f32 %v1103_v53, %v1439_v39  ;;  %v577_v56 = vpop.f32.mrb[21].mxu0  ;;  %v663_v57 = vmul.f32 %v1446_v44, %v639_v52 }
 0x2ae   :  { %v578_v59 = vadd.f32 %v1439_v39, %v577_v56  ;;  %v662_v0 = vmul.f32 %v1446_v44, %v638_v54 }
 0x2af   :  { %682 = vadd.xlane.f32.xlu1 %v663_v57  ;;  %676 = vadd.xlane.f32.xlu0 %v660_v58  ;;  %v641_v62 = vmax.f32 %v583_v55, 0.0 }
 0x2b0   :  { %v640_v60 = vmax.f32 %v578_v59, 0.0  ;;  %v1106_v61 = vpop.f32.mrb[22].mxu0 }
 0x2b1   :  { %v593_v63 = vadd.f32 %v1106_v61, %v1439_v39  ;;  %v587_v1 = vpop.f32.mrb[23].mxu0  ;;  %v665_v7 = vmul.f32 %v1446_v44, %v641_v62 }
 0x2b2   :  { %v664_v2 = vmul.f32 %v1446_v44, %v640_v60  ;;  %v588_v3 = vadd.f32 %v1439_v39, %v587_v1 }
 0x2b3   :  { %v643_v4 = vmax.f32 %v593_v63, 0.0  ;;  %680 = vadd.xlane.f32.xlu1 %v662_v0 }
 0x2b4   :  { %684 = vadd.xlane.f32.xlu0 %v664_v2  ;;  %v642_v5 = vmax.f32 %v588_v3, 0.0  ;;  %v1109_v6 = vpop.f32.mrb[24].mxu0 }
 0x2b5   :  { %v667_v8 = vmul.f32 %v1446_v44, %v643_v4  ;;  %v603_v9 = vadd.f32 %v1109_v6, %v1439_v39  ;;  %v597_v10 = vpop.f32.mrb[25].mxu0 }
 0x2b6   :  { %v666_v12 = vmul.f32 %v1446_v44, %v642_v5  ;;  %v598_v13 = vadd.f32 %v1439_v39, %v597_v10 }
 0x2b7   :  { %686 = vadd.xlane.f32.xlu1 %v665_v7  ;;  %v645_v11 = vmax.f32 %v603_v9, 0.0 }
 0x2b8   :  { %690 = vadd.xlane.f32.xlu0 %v667_v8  ;;  %v1112_v14 = vpop.f32.mrb[26].mxu0  ;;  %v644_v18 = vmax.f32 %v598_v13, 0.0 }
 0x2b9   :  { %v613_v15 = vadd.f32 %v1112_v14, %v1439_v39  ;;  %v607_v16 = vpop.f32.mrb[27].mxu0  ;;  %v669_v19 = vmul.f32 %v1446_v44, %v645_v11 }
 0x2ba   :  { %v608_v20 = vadd.f32 %v1439_v39, %v607_v16  ;;  %v668_v25 = vmul.f32 %v1446_v44, %v644_v18 }
 0x2bb   :  { %v647_v17 = vmax.f32 %v613_v15, 0.0 }
 0x2bc   :  { %688 = vadd.xlane.f32.xlu0 %v666_v12  ;;  %v1115_v21 = vpop.f32.mrb[28].mxu0  ;;  %v646_v24 = vmax.f32 %v608_v20, 0.0 }
 0x2bd   :  { %v617_v22 = vpop.f32.mrb[29].mxu0  ;;  %v671_v23 = vmul.f32 %v1446_v44, %v647_v17  ;;  %v623_v26 = vadd.f32 %v1115_v21, %v1439_v39 }
 0x2be   :  { %v670_v30 = vmul.f32 %v1446_v44, %v646_v24  ;;  %v618_v31 = vadd.f32 %v1439_v39, %v617_v22 }
 0x2bf   :  { %v649_v29 = vmax.f32 %v623_v26, 0.0 }
 0x2c0   :  { %694 = vadd.xlane.f32.xlu0 %v669_v19  ;;  %v1118_v27 = vpop.f32.mrb[30].mxu0  ;;  %v648_v33 = vmax.f32 %v618_v31, 0.0 }
 0x2c1   :  { %v627_v28 = vpop.f32.mrb[31].mxu0  ;;  %v673_v34 = vmul.f32 %v1446_v44, %v649_v29  ;;  %v633_v36 = vadd.f32 %v1118_v27, %v1439_v39 }
 0x2c2   :  { %v628_v35 = vadd.f32 %v1439_v39, %v627_v28  ;;  %v672_v38 = vmul.f32 %v1446_v44, %v648_v33  ;;  %v713_v39 = vlaneseq }
 0x2c3   :  { %v651_v40 = vmax.f32 %v633_v36, 0.0 }
 0x2c4   :  { %692 = vadd.xlane.f32.xlu0 %v668_v25  ;;  %v650_v37 = vmax.f32 %v628_v35, 0.0  ;;  %v1478_v52 = vshrl.u32 %v713_v39, 7  ;;  %v1481_v54 = vand.u32 127, %v713_v39 }
 0x2c5   :  { %v675_v42 = vmul.f32 %v1446_v44, %v651_v40 }
 0x2c6   :  { %v674_v41 = vmul.f32 %v1446_v44, %v650_v37  ;;  %v715_v53 = vsub.s32 0, %v1478_v52  ;;  %v755_v57 = vadd.s32 4294967288, %v1481_v54  ;;  %v762_v58 = vadd.s32 4294967280, %v1481_v54 }
 0x2c7   :  { %v753_v62 = vsub.s32 %v1481_v54, %v1478_v52  ;;  %v769_v4 = vadd.s32 4294967272, %v1481_v54  ;;  %v776_v7 = vadd.s32 4294967264, %v1481_v54  ;;  %v783_v11 = vadd.s32 4294967256, %v1481_v54 }
 0x2c8   :  { %710 = vperm.xlu1 %1192, %v653_v32   ;;  %696 = vadd.xlane.f32.xlu0 %v670_v30  ;;  %v758_v63 = vsub.s32 %v755_v57, %v1478_v52  ;;  %v765_v1 = vsub.s32 %v762_v58, %v1478_v52  ;;  %v790_v17 = vadd.s32 4294967248, %v1481_v54  ;;  %v804_v26 = vadd.s32 4294967232, %v1481_v54 }
 0x2c9   :  { %v772_v10 = vsub.s32 %v769_v4, %v1478_v52  ;;  %v779_v14 = vsub.s32 %v776_v7, %v1478_v52  ;;  %v786_v20 = vsub.s32 %v783_v11, %v1478_v52  ;;  %v811_v29 = vadd.s32 4294967224, %v1481_v54 }
 0x2ca   :  { %v793_v22 = vsub.s32 %v790_v17, %v1478_v52  ;;  %v818_v36 = vadd.s32 4294967216, %v1481_v54  ;;  %v839_v39 = vadd.s32 4294967192, %v1481_v54 }
 0x2cb   :  { %v814_v40 = vsub.s32 %v811_v29, %v1478_v52 }
 0x2cc   :  { %702 = vadd.xlane.f32.xlu0 %v673_v34  ;;  %v807_v34 = vsub.s32 %v804_v26, %v1478_v52 }
 0x2d0   :  { %700 = vadd.xlane.f32.xlu0 %v672_v38 }
 0x2d4   :  { %704 = vadd.xlane.f32.xlu0 %v674_v41 }
 0x2d8   :  { %706 = vadd.xlane.f32.xlu0 %v675_v42  ;;  %v825_v42 = vadd.s32 4294967208, %v1481_v54 }
 0x2ec   :  { %698 = vadd.xlane.f32.xlu1 %v671_v23  ;;  %v797_v23 = vadd.s32 4294967240, %v1481_v54 }
 0x2ee   :  { %v800_v32 = vsub.s32 %v797_v23, %v1478_v52 }
 0x338   :  { %v679_v43 = vpop.xlane.xlu0 %678 }
 0x33c   :  { %v677_v45 = vpop.xlane.xlu0 %676  ;;  %v683_v46 = vpop.xlane.xlu1 %682 }
 0x340   :  { %v681_v48 = vpop.xlane.xlu1 %680 }
 0x341   :  { %v685_v47 = vpop.xlane.xlu0 %684 }
 0x344   :  { %v687_v50 = vpop.xlane.xlu1 %686 }
 0x345   :  { %v691_v49 = vpop.xlane.xlu0 %690 }
 0x348   :  { %v711_v55 = vpop.permute.xlu1 %710 }
 0x349   :  { %v689_v51 = vpop.xlane.xlu0 %688  ;;  %v1483_v44 = vrot.slane %v711_v55, %v715_v53  ;;  %v828_v53 = vsub.s32 %v825_v42, %v1478_v52 }
 0x34b   :  { %v717_v60 = vadd.f32 %v1483_v44, %v677_v45  ;;  %v718_v61 = vadd.f32 %v1483_v44, %v679_v43  ;;  %v719_v0 = vadd.f32 %v1483_v44, %v681_v48  ;;  %v720_v8 = vadd.f32 %v1483_v44, %v683_v46 }
 0x34c   :  { %v721_v12 = vadd.f32 %v1483_v44, %v685_v47  ;;  %v722_v18 = vadd.f32 %v1483_v44, %v687_v50  ;;  %v723_v25 = vadd.f32 %v1483_v44, %v689_v51  ;;  %v724_v31 = vadd.f32 %v1483_v44, %v691_v49 }
 0x34d   :  { %v695_v56 = vpop.xlane.xlu0 %694  ;;  %v754_v2 = vrot.slane %v717_v60, %v753_v62  ;;  %v759_v3 = vrot.slane %v718_v61, %v758_v63  ;;  %v766_v6 = vrot.slane %v719_v0, %v765_v1  ;;  %v773_v16 = vrot.slane %v720_v8, %v772_v10 }
 0x34e   :  { %v780_v21 = vrot.slane %v721_v12, %v779_v14  ;;  %v787_v28 = vrot.slane %v722_v18, %v786_v20  ;;  %v794_v33 = vrot.slane %v723_v25, %v793_v22  ;;  %v801_v41 = vrot.slane %v724_v31, %v800_v32 }
 0x34f   :  { %v761_v9 = vsel %vm760_vm1, %v759_v3, %v754_v2  ;;  %v821_v45 = vsub.s32 %v818_v36, %v1478_v52  ;;  %v832_v47 = vadd.s32 4294967200, %v1481_v54  ;;  %v726_v48 = vadd.f32 %v1483_v44, %v695_v56 }
 0x350   :  { %v768_v13 = vsel %vm767_vm2, %v766_v6, %v761_v9  ;;  %v846_v50 = vadd.s32 4294967184, %v1481_v54  ;;  %v853_v51 = vadd.s32 4294967176, %v1481_v54  ;;  %v842_v62 = vsub.s32 %v839_v39, %v1478_v52 }
 0x351   :  { %v693_v59 = vpop.xlane.xlu0 %692  ;;  %v775_v19 = vsel %vm774_vm3, %v773_v16, %v768_v13  ;;  %v835_v58 = vsub.s32 %v832_v47, %v1478_v52  ;;  %v815_v61 = vrot.slane %v726_v48, %v814_v40 }
 0x352   :  { %v782_v24 = vsel %vm781_vm4, %v780_v21, %v775_v19  ;;  %v725_v35 = vadd.f32 %v1483_v44, %v693_v59  ;;  %v849_v54 = vsub.s32 %v846_v50, %v1478_v52  ;;  %v856_v2 = vsub.s32 %v853_v51, %v1478_v52 }
 0x353   :  { %v789_v30 = vsel %vm788_vm5, %v787_v28, %v782_v24 }
 0x354   :  { %v796_v37 = vsel %vm795_vm6, %v794_v33, %v789_v30  ;;  %v808_v43 = vrot.slane %v725_v35, %v807_v34 }
 0x355   :  { %v697_v5 = vpop.xlane.xlu0 %696  ;;  %v803_v49 = vsel %vm802_vm7, %v801_v41, %v796_v37 }
 0x356   :  { %v727_v46 = vadd.f32 %v1483_v44, %v697_v5  ;;  %v810_v55 = vsel %vm809_vm8, %v808_v43, %v803_v49 }
 0x357   :  { %v817_v3 = vsel %vm816_vm9, %v815_v61, %v810_v55 }
 0x358   :  { %v822_v57 = vrot.slane %v727_v46, %v821_v45 }
 0x359   :  { %v703_v15 = vpop.xlane.xlu0 %702 }
 0x35a   :  { %v730_v63 = vadd.f32 %v1483_v44, %v703_v15  ;;  %v824_v6 = vsel %vm823_vm10, %v822_v57, %v817_v3 }
 0x35c   :  { %v843_v8 = vrot.slane %v730_v63, %v842_v62 }
 0x35d   :  { %v701_v27 = vpop.xlane.xlu0 %700 }
 0x35e   :  { %v729_v59 = vadd.f32 %v1483_v44, %v701_v27 }
 0x360   :  { %v836_v7 = vrot.slane %v729_v59, %v835_v58 }
 0x361   :  { %v705_v38 = vpop.xlane.xlu0 %704 }
 0x362   :  { %v731_v1 = vadd.f32 %v1483_v44, %v705_v38 }
 0x364   :  { %v850_v10 = vrot.slane %v731_v1, %v849_v54 }
 0x365   :  { %v707_v60 = vpop.xlane.xlu0 %706 }
 0x366   :  { %v732_v4 = vadd.f32 %v1483_v44, %v707_v60 }
 0x368   :  { %v857_v52 = vrot.slane %v732_v4, %v856_v2 }
 0x379   :  { %v699_v56 = vpop.xlane.xlu1 %698 }
 0x37a   :  { %v728_v0 = vadd.f32 %v1483_v44, %v699_v56 }
 0x37c   :  { %v829_v5 = vrot.slane %v728_v0, %v828_v53 }
 0x37e   :  { %v831_v9 = vsel %vm830_vm11, %v829_v5, %v824_v6 }
 0x37f   :  { %v838_v11 = vsel %vm837_vm12, %v836_v7, %v831_v9 }
 0x380   :  { %v845_v12 = vsel %vm844_vm13, %v843_v8, %v838_v11 }
 0x381   :  { %v852_v13 = vsel %vm851_vm14, %v850_v10, %v845_v12 }
 0x382   :  { %v859_v14 = vsel %vm858_vm15, %v857_v52, %v852_v13 }
 0x383   :  { %861 = vst [vmem:[#allocation6] sm:$0x1] %v859_v14 }
 0x384   :  { %1227 = shalt.err (!%p1224_p12)
}
 0x385   :  { %s1228_s28 = scalar_lea.hbm %s1556_s9, 16 }
 0x386   :  { %p1229_p13 = scmp.ne.s32.totalorder %s1556_s9, %s1228_s28  ;;  %p1232_p0 = scmp.lt.u32.totalorder %s1228_s28, %s1556_s9 }
 0x388   :  { %p1234_p1 = pnand %p1232_p0, %p1229_p13 }
 0x38a   :  { %1237 = shalt.err (!%p1234_p1)
}
 0x38b   :  { %871 = dma.vmem_to_hbm [thread:$0]  %s869_s7, 16, %s1556_s9, [#allocation5]  }
 0x38c   :  { %1240 = dma.done.wait [#allocation5], 16  }
 0x38d   :  { %1241 = vsyncadd [#allocation5], 4294967280 }
 0x38e   :  { %875 = vsyncpa [#allocation4], 1 }
 0x38f   :  { %876 = vsyncpa [#allocation5], 1 }

</bundles_post_ra>
